<compile_context>
chip_gen: v6e
topology: v6e:2x2x1
jax: 0.10.0
libtpu: 0.0.40
codegen_flags: <defaults>
</compile_context>

<pallas_src>
import jax
import jax.numpy as jnp
from jax.experimental import pallas as pl
from jax.experimental.pallas import tpu as pltpu


def _round_up(x, m):
    return (x + m - 1) // m * m


def _vmem_capacity_bytes():
    """Physical per-core VMEM; conservative 64 MiB fallback (v7x-sized) if query fails."""
    try:
        cap = int(pltpu.get_tpu_info().vmem_capacity_bytes)
        if cap > 0:
            return cap
    except Exception:
        pass
    return 64 * 1024 * 1024


def _num_tensorcores_per_chip():
    """Heuristic TC count per device; only used to decide the batch split (perf only)."""
    try:
        kind = jax.devices()[0].device_kind.lower()
    except Exception:
        return 1
    if any(tag in kind for tag in ("v4", "v5p", "v7", "7x")):
        return 2
    return 1


def _choose_time_chunk(T, Bb, Din, H, G, vmem_cap):
    """Largest Tc (capped at 128) whose double-buffered slabs + scratch fit ~70% of VMEM."""
    budget = int(vmem_cap * 0.7)
    # resident weights (budgeted double-buffered, bf16) + bias (f32) + h/c carries (f32)
    fixed = 2 * (Din * G + H * G) * 2 + 2 * G * 4 + 2 * Bb * H * 4
    # per-timestep: x chunk (2 buf, bf16) + out chunk (2 buf, bf16) + gx scratch (f32)
    per_t = Bb * (2 * Din * 2 + 2 * H * 2 + G * 4)
    tc = (budget - fixed) // max(per_t, 1)
    return int(max(1, min(tc, 128, T)))


def lstm_kernel(x_ref, wih_ref, whh_ref, bias_ref, out_ref, h_sc, c_sc, gx_sc):
    """One grid step = Tc timesteps for one batch block.

    x_ref   : (Tc*Bb, Din) bf16  input chunk (time-major, batch minor)
    wih_ref : (Din, G)     bf16  input weights, VMEM resident
    whh_ref : (H,   G)     bf16  recurrent weights, VMEM resident
    bias_ref: (1,   G)     f32   b_ih + b_hh (gate-packed)
    out_ref : (Tc*Bb, H)   bf16  hidden states
    h_sc/c_sc: (Bb, H) f32 carries across time chunks
    gx_sc   : (Tc*Bb, G)   f32   chunk input projection
    """
    tchunk = pl.program_id(1)

    @pl.when(tchunk == 0)
    def _():
        h_sc[...] = jnp.zeros_like(h_sc)
        c_sc[...] = jnp.zeros_like(c_sc)

    bb, hid = h_sc.shape
    tc = x_ref.shape[0] // bb

    # Fused input projection for the whole time chunk: one big bf16 MXU matmul with f32
    # accumulation, no cross-timestep dependency -> off the serial chain, overlaps pipeline.
    gx_sc[...] = jnp.dot(x_ref[...], wih_ref[...],
                         preferred_element_type=jnp.float32) + bias_ref[...]

    def step(s, carry):
        row = pl.multiple_of(s * bb, bb)
        # Only this small recurrent dot is on the serial chain (bf16 operands, f32 acc).
        gates = gx_sc[pl.ds(row, bb), :] + jnp.dot(
            h_sc[...].astype(jnp.bfloat16), whh_ref[...],
            preferred_element_type=jnp.float32)            # (Bb, G)
        # PyTorch gate order i, f, g, o; gates packed compactly at stride H.
        i_g = jax.nn.sigmoid(gates[:, 0 * hid:1 * hid])
        f_g = jax.nn.sigmoid(gates[:, 1 * hid:2 * hid])
        g_g = jnp.tanh(gates[:, 2 * hid:3 * hid])
        o_g = jax.nn.sigmoid(gates[:, 3 * hid:4 * hid])
        c_new = f_g * c_sc[...] + i_g * g_g
        h_new = o_g * jnp.tanh(c_new)
        c_sc[...] = c_new
        h_sc[...] = h_new
        out_ref[pl.ds(row, bb), :] = h_new.astype(out_ref.dtype)
        return carry

    # Partial unroll keeps LLO scheduling visibility without blowing up code/vreg pressure.
    jax.lax.fori_loop(0, tc, step, 0, unroll=min(8, tc))


def run_lstm_recurrence(x_blk, wih_p, whh_p, bias_p, *, hidden, time_chunk, vmem_limit):
    """x_blk: (nb, T_pad*Bb, Din) bf16 block-major input. Returns (nb, T_pad*Bb, H) bf16."""
    nb, rows, d_in = x_blk.shape
    G = wih_p.shape[-1]
    H = hidden
    Bb = whh_p.shape[0]  # unused for Bb; derive from rows/time below
    Tc = time_chunk
    Bb = rows // ((rows // 1))  # placeholder, recomputed by caller-consistent math below
    # rows = T_pad * Bb; caller guarantees consistency — recover Bb from scratch spec arg:
    # (passed implicitly: rows % Tc_rows == 0 with Tc_rows = Tc * Bb)
    # Caller passes Bb via closure-free arithmetic:
    raise_if = None  # no-op
    del raise_if
    # NOTE: Bb is supplied by the caller through `_bb` attribute on the function call below.
    return None  # replaced by run_lstm_recurrence_impl


def run_lstm_recurrence_impl(x_blk, wih_p, whh_p, bias_p, *, hidden, batch_block,
                             time_chunk, vmem_limit):
    nb, rows, d_in = x_blk.shape
    G = wih_p.shape[-1]
    H = hidden
    Bb = batch_block
    Tc = time_chunk
    nt = rows // (Tc * Bb)

    return pl.pallas_call(
        lstm_kernel,
        out_shape=jax.ShapeDtypeStruct((nb, rows, H), jnp.bfloat16),
        grid_spec=pltpu.PrefetchScalarGridSpec(
            num_scalar_prefetch=0,
            grid=(nb, nt),
            in_specs=[
                pl.BlockSpec((None, Tc * Bb, d_in), lambda b, t: (b, t, 0)),  # x chunk
                pl.BlockSpec((d_in, G), lambda b, t: (0, 0)),                 # W_ih (resident)
                pl.BlockSpec((H, G), lambda b, t: (0, 0)),                    # W_hh (resident)
                pl.BlockSpec((1, G), lambda b, t: (0, 0)),                    # bias (resident)
            ],
            out_specs=pl.BlockSpec((None, Tc * Bb, H), lambda b, t: (b, t, 0)),
            scratch_shapes=[
                pltpu.VMEM((Bb, H), jnp.float32),        # h carry
                pltpu.VMEM((Bb, H), jnp.float32),        # c carry
                pltpu.VMEM((Tc * Bb, G), jnp.float32),   # chunk input projection
            ],
        ),
        compiler_params=pltpu.CompilerParams(
            # batch blocks independent (2-TC split); time is a strict recurrence
            dimension_semantics=("parallel", "arbitrary"),
            vmem_limit_bytes=vmem_limit),
    )(x_blk, wih_p, whh_p, bias_p)


def lstm_layer_forward(x_btd, params, hidden_size):
    """Equivalent of LSTMLayer.forward(x): (B, T, D) -> (num_layers, B, T, H)."""
    B, T, Din0 = x_btd.shape
    H = hidden_size
    G = _round_up(4 * H, 128)          # compact gate packing, lane-padded slab

    # Batch split only on 2-TC chips and only when each core keeps a throughput-relevant block.
    num_tc = _num_tensorcores_per_chip()
    nb = num_tc if (num_tc > 1 and B >= 64 * num_tc) else 1
    B_pad = _round_up(B, 8 * nb)
    Bb = B_pad // nb

    vmem_cap = _vmem_capacity_bytes()
    Din_max = max(Din0, H)
    Tc = _choose_time_chunk(T, Bb, Din_max, H, G, vmem_cap)
    T_pad = _round_up(T, Tc)

    # Explicit scoped-VMEM limit: actual need (worst-case layer) + headroom, clamped below
    # physical VMEM of the detected generation (no hard-coded v7x 60 MiB cap on 128 MiB parts).
    need = (2 * (Din_max * G + H * G) * 2        # double-buffered bf16 weights
            + 2 * G * 4 + 2 * Bb * H * 4         # bias + carries
            + 2 * Tc * Bb * Din_max * 2          # x chunk, 2 buffers, bf16
            + 2 * Tc * Bb * H * 2                # out chunk, 2 buffers, bf16
            + Tc * Bb * G * 4)                   # gx scratch, f32
    vmem_limit = int(min(vmem_cap - 4 * 2 ** 20, max(32 * 2 ** 20, need + 4 * 2 ** 20)))
    vmem_limit = max(vmem_limit, 16 * 2 ** 20)

    # Time-major once, trailing zero padding of T and B (never contaminates valid outputs),
    # block-major batch layout so each per-block DMA is one contiguous slab.
    x_tm = jnp.transpose(x_btd, (1, 0, 2)).astype(jnp.float32)
    x_tm = jnp.pad(x_tm, ((0, T_pad - T), (0, B_pad - B), (0, 0)))
    x_blk = jnp.transpose(x_tm.reshape(T_pad, nb, Bb, Din0), (1, 0, 2, 3))
    x_blk = x_blk.reshape(nb, T_pad * Bb, Din0).astype(jnp.bfloat16)

    layer_outs = []
    for (w_ih, w_hh, b_ih, b_hh) in params:
        # torch (4H, Din) -> (Din, G) bf16, gates packed compactly at stride H, zero pad lanes.
        wih_p = jnp.pad(w_ih.T, ((0, 0), (0, G - 4 * H))).astype(jnp.bfloat16)
        whh_p = jnp.pad(w_hh.T, ((0, 0), (0, G - 4 * H))).astype(jnp.bfloat16)
        bias_p = jnp.pad(b_ih + b_hh, (0, G - 4 * H)).reshape(1, G).astype(jnp.float32)

        out_blk = run_lstm_recurrence_impl(
            x_blk, wih_p, whh_p, bias_p,
            hidden=H, batch_block=Bb, time_chunk=Tc, vmem_limit=vmem_limit)
        layer_outs.append(out_blk)
        x_blk = out_blk                      # bf16 hand-off, next layer projects it in-kernel

    # Single stack / transpose at the very end (no per-layer HBM relayouts).
    L = len(params)
    stacked = jnp.stack(layer_outs, axis=0)                      # (L, nb, T_pad*Bb, H)
    out = stacked.reshape(L, nb, T_pad, Bb, H)
    out = jnp.transpose(out, (0, 1, 3, 2, 4)).reshape(L, B_pad, T_pad, H)
    return out[:, :B, :T, :].astype(jnp.float32)                 # (L, B, T, H) batch_first


def init_lstm_params(key, input_size, hidden_size, num_layers):
    """Deterministic init matching torch.nn.LSTM default: U(-1/sqrt(H), 1/sqrt(H))."""
    params = []
    bound = 1.0 / float(hidden_size) ** 0.5
    in_sz = input_size
    for _ in range(num_layers):
        key, k1, k2, k3, k4 = jax.random.split(key, 5)
        w_ih = jax.random.uniform(k1, (4 * hidden_size, in_sz), jnp.float32, -bound, bound)
        w_hh = jax.random.uniform(k2, (4 * hidden_size, hidden_size), jnp.float32, -bound, bound)
        b_ih = jax.random.uniform(k3, (4 * hidden_size,), jnp.float32, -bound, bound)
        b_hh = jax.random.uniform(k4, (4 * hidden_size,), jnp.float32, -bound, bound)
        params.append((w_ih, w_hh, b_ih, b_hh))
        in_sz = hidden_size
    return params


def lstm_layer_reference(x_btd, params, hidden_size):
    """Pure-JAX f32 reference matching torch nn.LSTM semantics."""
    B, T, _ = x_btd.shape
    H = hidden_size
    outputs = []
    x = x_btd.astype(jnp.float32)
    for (w_ih, w_hh, b_ih, b_hh) in params:
        h = jnp.zeros((B, H), jnp.float32)
        c = jnp.zeros((B, H), jnp.float32)
        bias = b_ih + b_hh
        ys = []
        for t in range(T):
            gates = x[:, t, :] @ w_ih.T + h @ w_hh.T + bias
            i_g = jax.nn.sigmoid(gates[:, 0 * H:1 * H])
            f_g = jax.nn.sigmoid(gates[:, 1 * H:2 * H])
            g_g = jnp.tanh(gates[:, 2 * H:3 * H])
            o_g = jax.nn.sigmoid(gates[:, 3 * H:4 * H])
            c = f_g * c + i_g * g_g
            h = o_g * jnp.tanh(c)
            ys.append(h)
        x = jnp.stack(ys, axis=1)     # (B, T, H)
        outputs.append(x)
    return jnp.stack(outputs, axis=0)


if __name__ == "__main__":
    # Small shapes consistent with the module's forward (batch_first sequence input).
    batch, seq_len, input_size, hidden_size, num_layers = 8, 8, 32, 32, 2

    key = jax.random.PRNGKey(0)
    key, kx, kp = jax.random.split(key, 3)
    x = jax.random.normal(kx, (batch, seq_len, input_size), jnp.float32)
    params = init_lstm_params(kp, input_size, hidden_size, num_layers)

    out = lstm_layer_forward(x, params, hidden_size)
    out = jax.block_until_ready(out)
    assert out.shape == (num_layers, batch, seq_len, hidden_size)

    # Tolerance vs all-f32 reference (bf16 MXU operands / bf16 inter-layer hand-off, f32 acc).
    ref = lstm_layer_reference(x, params, hidden_size)
    max_err = float(jnp.max(jnp.abs(out - ref)))
    assert max_err < 3e-2, f"max abs error vs reference too large: {max_err}"
    print("KERNEL_OK")
</pallas_src>

<mosaic_0001>
module attributes {stable_mosaic.version = 11 : i64} {
  func.func @lstm_kernel(%arg0: i32, %arg1: i32, %arg2: memref<1x64x32xbf16, #tpu.memory_space<vmem>>, %arg3: memref<32x128xbf16, #tpu.memory_space<vmem>>, %arg4: memref<32x128xbf16, #tpu.memory_space<vmem>>, %arg5: memref<1x128xf32, #tpu.memory_space<vmem>>, %arg6: memref<1x64x32xbf16, #tpu.memory_space<vmem>>, %arg7: memref<8x32xf32, #tpu.memory_space<vmem>>, %arg8: memref<8x32xf32, #tpu.memory_space<vmem>>, %arg9: memref<64x128xf32, #tpu.memory_space<vmem>>) attributes {dimension_semantics = [#tpu.dimension_semantics<parallel>, #tpu.dimension_semantics<arbitrary>], iteration_bounds = array<i64: 1, 1>, scalar_prefetch = 0 : i64, scratch_operands = 3 : i64, tpu.core_type = #tpu.core_type<tc>, window_params = [{transform_indices = @transform_0, window_bounds = array<i64: 1, 64, 32>}, {pipeline_mode = #tpu.pipeline_mode<synchronous>, transform_indices = @transform_1, window_bounds = array<i64: 32, 128>}, {pipeline_mode = #tpu.pipeline_mode<synchronous>, transform_indices = @transform_2, window_bounds = array<i64: 32, 128>}, {pipeline_mode = #tpu.pipeline_mode<synchronous>, transform_indices = @transform_3, window_bounds = array<i64: 1, 128>}, {transform_indices = @transform_4, window_bounds = array<i64: 1, 64, 32>}]} {
    %c0_i32 = arith.constant 0 : i32
    %0 = arith.cmpi eq, %arg1, %c0_i32 : i32
    %1 = arith.extui %0 : i1 to i32
    %c0_i32_0 = arith.constant 0 : i32
    %2 = arith.cmpi ne, %1, %c0_i32_0 : i32
    scf.if %2 {
      %cst_154 = arith.constant 0.000000e+00 : f32
      %347 = vector.broadcast %cst_154 : f32 to vector<8x32xf32>
      %c0_155 = arith.constant 0 : index
      %c0_156 = arith.constant 0 : index
      %348 = vector.load %arg7[%c0_155, %c0_156] : memref<8x32xf32, #tpu.memory_space<vmem>>, vector<8x32xf32>
      tpu.vector_store %arg7[%c0_155, %c0_156], %347 {strides = array<i32>} : memref<8x32xf32, #tpu.memory_space<vmem>>, vector<8x32xf32>,
      %cst_157 = arith.constant 0.000000e+00 : f32
      %349 = vector.broadcast %cst_157 : f32 to vector<8x32xf32>
      %c0_158 = arith.constant 0 : index
      %c0_159 = arith.constant 0 : index
      %350 = vector.load %arg8[%c0_158, %c0_159] : memref<8x32xf32, #tpu.memory_space<vmem>>, vector<8x32xf32>
      tpu.vector_store %arg8[%c0_158, %c0_159], %349 {strides = array<i32>} : memref<8x32xf32, #tpu.memory_space<vmem>>, vector<8x32xf32>,
    } else {
    }
    %c0 = arith.constant 0 : index
    %c0_1 = arith.constant 0 : index
    %c0_2 = arith.constant 0 : index
    %3 = vector.load %arg2[%c0, %c0_1, %c0_2] : memref<1x64x32xbf16, #tpu.memory_space<vmem>>, vector<1x64x32xbf16>
    %4 = vector.shape_cast %3 : vector<1x64x32xbf16> to vector<64x32xbf16>
    %c0_3 = arith.constant 0 : index
    %c0_4 = arith.constant 0 : index
    %5 = vector.load %arg3[%c0_3, %c0_4] : memref<32x128xbf16, #tpu.memory_space<vmem>>, vector<32x128xbf16>
    %cst = arith.constant dense<0.000000e+00> : vector<64x128xf32>
    %6 = tpu.matmul %4, %5, %cst {dimension_numbers = #tpu.dot_dimension_numbers<[1], [0], [0], [1], [0, 0, 1, 1], [], []>} : vector<64x32xbf16>, vector<32x128xbf16>, vector<64x128xf32> -> vector<64x128xf32>
    %c0_5 = arith.constant 0 : index
    %c0_6 = arith.constant 0 : index
    %7 = vector.load %arg5[%c0_5, %c0_6] : memref<1x128xf32, #tpu.memory_space<vmem>>, vector<1x128xf32>
    %8 = vector.broadcast %7 : vector<1x128xf32> to vector<64x128xf32>
    %9 = arith.addf %6, %8 : vector<64x128xf32>
    %c0_7 = arith.constant 0 : index
    %c0_8 = arith.constant 0 : index
    %10 = vector.load %arg9[%c0_7, %c0_8] : memref<64x128xf32, #tpu.memory_space<vmem>>, vector<64x128xf32>
    tpu.vector_store %arg9[%c0_7, %c0_8], %9 {strides = array<i32>} : memref<64x128xf32, #tpu.memory_space<vmem>>, vector<64x128xf32>,
    %c0_i32_9 = arith.constant 0 : i32
    %c8_i32 = arith.constant 8 : i32
    %11 = arith.muli %c0_i32_9, %c8_i32 : i32
    %12 = tpu.assume_multiple %11, 8 : i32
    %13 = arith.index_cast %12 : i32 to index
    %c0_10 = arith.constant 0 : index
    %14 = vector.load %arg9[%13, %c0_10] : memref<64x128xf32, #tpu.memory_space<vmem>>, vector<8x128xf32>
    %c0_11 = arith.constant 0 : index
    %c0_12 = arith.constant 0 : index
    %15 = vector.load %arg7[%c0_11, %c0_12] : memref<8x32xf32, #tpu.memory_space<vmem>>, vector<8x32xf32>
    %16 = arith.truncf %15 : vector<8x32xf32> to vector<8x32xbf16>
    %c0_13 = arith.constant 0 : index
    %c0_14 = arith.constant 0 : index
    %17 = vector.load %arg4[%c0_13, %c0_14] : memref<32x128xbf16, #tpu.memory_space<vmem>>, vector<32x128xbf16>
    %cst_15 = arith.constant dense<0.000000e+00> : vector<8x128xf32>
    %18 = tpu.matmul %16, %17, %cst_15 {dimension_numbers = #tpu.dot_dimension_numbers<[1], [0], [0], [1], [0, 0, 1, 1], [], []>} : vector<8x32xbf16>, vector<32x128xbf16>, vector<8x128xf32> -> vector<8x128xf32>
    %19 = arith.addf %14, %18 : vector<8x128xf32>
    %20 = vector.extract_strided_slice %19 {offsets = [0, 0], sizes = [8, 32], strides = [1, 1]} : vector<8x128xf32> to vector<8x32xf32>
    %21 = arith.negf %20 : vector<8x32xf32>
    %22 = math.exp %21 : vector<8x32xf32>
    %cst_16 = arith.constant 1.000000e+00 : f32
    %23 = vector.broadcast %cst_16 : f32 to vector<8x32xf32>
    %24 = arith.addf %23, %22 : vector<8x32xf32>
    %25 = arith.divf %23, %24 : vector<8x32xf32>
    %26 = vector.extract_strided_slice %19 {offsets = [0, 32], sizes = [8, 32], strides = [1, 1]} : vector<8x128xf32> to vector<8x32xf32>
    %27 = arith.negf %26 : vector<8x32xf32>
    %28 = math.exp %27 : vector<8x32xf32>
    %cst_17 = arith.constant 1.000000e+00 : f32
    %29 = vector.broadcast %cst_17 : f32 to vector<8x32xf32>
    %30 = arith.addf %29, %28 : vector<8x32xf32>
    %31 = arith.divf %29, %30 : vector<8x32xf32>
    %32 = vector.extract_strided_slice %19 {offsets = [0, 64], sizes = [8, 32], strides = [1, 1]} : vector<8x128xf32> to vector<8x32xf32>
    %33 = math.tanh %32 : vector<8x32xf32>
    %34 = vector.extract_strided_slice %19 {offsets = [0, 96], sizes = [8, 32], strides = [1, 1]} : vector<8x128xf32> to vector<8x32xf32>
    %35 = arith.negf %34 : vector<8x32xf32>
    %36 = math.exp %35 : vector<8x32xf32>
    %cst_18 = arith.constant 1.000000e+00 : f32
    %37 = vector.broadcast %cst_18 : f32 to vector<8x32xf32>
    %38 = arith.addf %37, %36 : vector<8x32xf32>
    %39 = arith.divf %37, %38 : vector<8x32xf32>
    %c0_19 = arith.constant 0 : index
    %c0_20 = arith.constant 0 : index
    %40 = vector.load %arg8[%c0_19, %c0_20] : memref<8x32xf32, #tpu.memory_space<vmem>>, vector<8x32xf32>
    %41 = arith.mulf %31, %40 : vector<8x32xf32>
    %42 = arith.mulf %25, %33 : vector<8x32xf32>
    %43 = arith.addf %41, %42 : vector<8x32xf32>
    %44 = math.tanh %43 : vector<8x32xf32>
    %45 = arith.mulf %39, %44 : vector<8x32xf32>
    %c0_21 = arith.constant 0 : index
    %c0_22 = arith.constant 0 : index
    %46 = vector.load %arg8[%c0_21, %c0_22] : memref<8x32xf32, #tpu.memory_space<vmem>>, vector<8x32xf32>
    tpu.vector_store %arg8[%c0_21, %c0_22], %43 {strides = array<i32>} : memref<8x32xf32, #tpu.memory_space<vmem>>, vector<8x32xf32>,
    %c0_23 = arith.constant 0 : index
    %c0_24 = arith.constant 0 : index
    %47 = vector.load %arg7[%c0_23, %c0_24] : memref<8x32xf32, #tpu.memory_space<vmem>>, vector<8x32xf32>
    tpu.vector_store %arg7[%c0_23, %c0_24], %45 {strides = array<i32>} : memref<8x32xf32, #tpu.memory_space<vmem>>, vector<8x32xf32>,
    %48 = arith.truncf %45 : vector<8x32xf32> to vector<8x32xbf16>
    %c0_25 = arith.constant 0 : index
    %49 = arith.index_cast %12 : i32 to index
    %c0_26 = arith.constant 0 : index
    %50 = vector.load %arg6[%c0_25, %49, %c0_26] : memref<1x64x32xbf16, #tpu.memory_space<vmem>>, vector<1x8x32xbf16>
    %51 = vector.shape_cast %50 : vector<1x8x32xbf16> to vector<8x32xbf16>
    %52 = vector.shape_cast %48 : vector<8x32xbf16> to vector<1x8x32xbf16>
    tpu.vector_store %arg6[%c0_25, %49, %c0_26], %52 {strides = array<i32>} : memref<1x64x32xbf16, #tpu.memory_space<vmem>>, vector<1x8x32xbf16>,
    %c1_i32 = arith.constant 1 : i32
    %c8_i32_27 = arith.constant 8 : i32
    %53 = arith.muli %c1_i32, %c8_i32_27 : i32
    %54 = tpu.assume_multiple %53, 8 : i32
    %55 = arith.index_cast %54 : i32 to index
    %c0_28 = arith.constant 0 : index
    %56 = vector.load %arg9[%55, %c0_28] : memref<64x128xf32, #tpu.memory_space<vmem>>, vector<8x128xf32>
    %c0_29 = arith.constant 0 : index
    %c0_30 = arith.constant 0 : index
    %57 = vector.load %arg7[%c0_29, %c0_30] : memref<8x32xf32, #tpu.memory_space<vmem>>, vector<8x32xf32>
    %58 = arith.truncf %57 : vector<8x32xf32> to vector<8x32xbf16>
    %c0_31 = arith.constant 0 : index
    %c0_32 = arith.constant 0 : index
    %59 = vector.load %arg4[%c0_31, %c0_32] : memref<32x128xbf16, #tpu.memory_space<vmem>>, vector<32x128xbf16>
    %cst_33 = arith.constant dense<0.000000e+00> : vector<8x128xf32>
    %60 = tpu.matmul %58, %59, %cst_33 {dimension_numbers = #tpu.dot_dimension_numbers<[1], [0], [0], [1], [0, 0, 1, 1], [], []>} : vector<8x32xbf16>, vector<32x128xbf16>, vector<8x128xf32> -> vector<8x128xf32>
    %61 = arith.addf %56, %60 : vector<8x128xf32>
    %62 = vector.extract_strided_slice %61 {offsets = [0, 0], sizes = [8, 32], strides = [1, 1]} : vector<8x128xf32> to vector<8x32xf32>
    %63 = arith.negf %62 : vector<8x32xf32>
    %64 = math.exp %63 : vector<8x32xf32>
    %cst_34 = arith.constant 1.000000e+00 : f32
    %65 = vector.broadcast %cst_34 : f32 to vector<8x32xf32>
    %66 = arith.addf %65, %64 : vector<8x32xf32>
    %67 = arith.divf %65, %66 : vector<8x32xf32>
    %68 = vector.extract_strided_slice %61 {offsets = [0, 32], sizes = [8, 32], strides = [1, 1]} : vector<8x128xf32> to vector<8x32xf32>
    %69 = arith.negf %68 : vector<8x32xf32>
    %70 = math.exp %69 : vector<8x32xf32>
    %cst_35 = arith.constant 1.000000e+00 : f32
    %71 = vector.broadcast %cst_35 : f32 to vector<8x32xf32>
    %72 = arith.addf %71, %70 : vector<8x32xf32>
    %73 = arith.divf %71, %72 : vector<8x32xf32>
    %74 = vector.extract_strided_slice %61 {offsets = [0, 64], sizes = [8, 32], strides = [1, 1]} : vector<8x128xf32> to vector<8x32xf32>
    %75 = math.tanh %74 : vector<8x32xf32>
    %76 = vector.extract_strided_slice %61 {offsets = [0, 96], sizes = [8, 32], strides = [1, 1]} : vector<8x128xf32> to vector<8x32xf32>
    %77 = arith.negf %76 : vector<8x32xf32>
    %78 = math.exp %77 : vector<8x32xf32>
    %cst_36 = arith.constant 1.000000e+00 : f32
    %79 = vector.broadcast %cst_36 : f32 to vector<8x32xf32>
    %80 = arith.addf %79, %78 : vector<8x32xf32>
    %81 = arith.divf %79, %80 : vector<8x32xf32>
    %c0_37 = arith.constant 0 : index
    %c0_38 = arith.constant 0 : index
    %82 = vector.load %arg8[%c0_37, %c0_38] : memref<8x32xf32, #tpu.memory_space<vmem>>, vector<8x32xf32>
    %83 = arith.mulf %73, %82 : vector<8x32xf32>
    %84 = arith.mulf %67, %75 : vector<8x32xf32>
    %85 = arith.addf %83, %84 : vector<8x32xf32>
    %86 = math.tanh %85 : vector<8x32xf32>
    %87 = arith.mulf %81, %86 : vector<8x32xf32>
    %c0_39 = arith.constant 0 : index
    %c0_40 = arith.constant 0 : index
    %88 = vector.load %arg8[%c0_39, %c0_40] : memref<8x32xf32, #tpu.memory_space<vmem>>, vector<8x32xf32>
    tpu.vector_store %arg8[%c0_39, %c0_40], %85 {strides = array<i32>} : memref<8x32xf32, #tpu.memory_space<vmem>>, vector<8x32xf32>,
    %c0_41 = arith.constant 0 : index
    %c0_42 = arith.constant 0 : index
    %89 = vector.load %arg7[%c0_41, %c0_42] : memref<8x32xf32, #tpu.memory_space<vmem>>, vector<8x32xf32>
    tpu.vector_store %arg7[%c0_41, %c0_42], %87 {strides = array<i32>} : memref<8x32xf32, #tpu.memory_space<vmem>>, vector<8x32xf32>,
    %90 = arith.truncf %87 : vector<8x32xf32> to vector<8x32xbf16>
    %c0_43 = arith.constant 0 : index
    %91 = arith.index_cast %54 : i32 to index
    %c0_44 = arith.constant 0 : index
    %92 = vector.load %arg6[%c0_43, %91, %c0_44] : memref<1x64x32xbf16, #tpu.memory_space<vmem>>, vector<1x8x32xbf16>
    %93 = vector.shape_cast %92 : vector<1x8x32xbf16> to vector<8x32xbf16>
    %94 = vector.shape_cast %90 : vector<8x32xbf16> to vector<1x8x32xbf16>
    tpu.vector_store %arg6[%c0_43, %91, %c0_44], %94 {strides = array<i32>} : memref<1x64x32xbf16, #tpu.memory_space<vmem>>, vector<1x8x32xbf16>,
    %c2_i32 = arith.constant 2 : i32
    %c8_i32_45 = arith.constant 8 : i32
    %95 = arith.muli %c2_i32, %c8_i32_45 : i32
    %96 = tpu.assume_multiple %95, 8 : i32
    %97 = arith.index_cast %96 : i32 to index
    %c0_46 = arith.constant 0 : index
    %98 = vector.load %arg9[%97, %c0_46] : memref<64x128xf32, #tpu.memory_space<vmem>>, vector<8x128xf32>
    %c0_47 = arith.constant 0 : index
    %c0_48 = arith.constant 0 : index
    %99 = vector.load %arg7[%c0_47, %c0_48] : memref<8x32xf32, #tpu.memory_space<vmem>>, vector<8x32xf32>
    %100 = arith.truncf %99 : vector<8x32xf32> to vector<8x32xbf16>
    %c0_49 = arith.constant 0 : index
    %c0_50 = arith.constant 0 : index
    %101 = vector.load %arg4[%c0_49, %c0_50] : memref<32x128xbf16, #tpu.memory_space<vmem>>, vector<32x128xbf16>
    %cst_51 = arith.constant dense<0.000000e+00> : vector<8x128xf32>
    %102 = tpu.matmul %100, %101, %cst_51 {dimension_numbers = #tpu.dot_dimension_numbers<[1], [0], [0], [1], [0, 0, 1, 1], [], []>} : vector<8x32xbf16>, vector<32x128xbf16>, vector<8x128xf32> -> vector<8x128xf32>
    %103 = arith.addf %98, %102 : vector<8x128xf32>
    %104 = vector.extract_strided_slice %103 {offsets = [0, 0], sizes = [8, 32], strides = [1, 1]} : vector<8x128xf32> to vector<8x32xf32>
    %105 = arith.negf %104 : vector<8x32xf32>
    %106 = math.exp %105 : vector<8x32xf32>
    %cst_52 = arith.constant 1.000000e+00 : f32
    %107 = vector.broadcast %cst_52 : f32 to vector<8x32xf32>
    %108 = arith.addf %107, %106 : vector<8x32xf32>
    %109 = arith.divf %107, %108 : vector<8x32xf32>
    %110 = vector.extract_strided_slice %103 {offsets = [0, 32], sizes = [8, 32], strides = [1, 1]} : vector<8x128xf32> to vector<8x32xf32>
    %111 = arith.negf %110 : vector<8x32xf32>
    %112 = math.exp %111 : vector<8x32xf32>
    %cst_53 = arith.constant 1.000000e+00 : f32
    %113 = vector.broadcast %cst_53 : f32 to vector<8x32xf32>
    %114 = arith.addf %113, %112 : vector<8x32xf32>
    %115 = arith.divf %113, %114 : vector<8x32xf32>
    %116 = vector.extract_strided_slice %103 {offsets = [0, 64], sizes = [8, 32], strides = [1, 1]} : vector<8x128xf32> to vector<8x32xf32>
    %117 = math.tanh %116 : vector<8x32xf32>
    %118 = vector.extract_strided_slice %103 {offsets = [0, 96], sizes = [8, 32], strides = [1, 1]} : vector<8x128xf32> to vector<8x32xf32>
    %119 = arith.negf %118 : vector<8x32xf32>
    %120 = math.exp %119 : vector<8x32xf32>
    %cst_54 = arith.constant 1.000000e+00 : f32
    %121 = vector.broadcast %cst_54 : f32 to vector<8x32xf32>
    %122 = arith.addf %121, %120 : vector<8x32xf32>
    %123 = arith.divf %121, %122 : vector<8x32xf32>
    %c0_55 = arith.constant 0 : index
    %c0_56 = arith.constant 0 : index
    %124 = vector.load %arg8[%c0_55, %c0_56] : memref<8x32xf32, #tpu.memory_space<vmem>>, vector<8x32xf32>
    %125 = arith.mulf %115, %124 : vector<8x32xf32>
    %126 = arith.mulf %109, %117 : vector<8x32xf32>
    %127 = arith.addf %125, %126 : vector<8x32xf32>
    %128 = math.tanh %127 : vector<8x32xf32>
    %129 = arith.mulf %123, %128 : vector<8x32xf32>
    %c0_57 = arith.constant 0 : index
    %c0_58 = arith.constant 0 : index
    %130 = vector.load %arg8[%c0_57, %c0_58] : memref<8x32xf32, #tpu.memory_space<vmem>>, vector<8x32xf32>
    tpu.vector_store %arg8[%c0_57, %c0_58], %127 {strides = array<i32>} : memref<8x32xf32, #tpu.memory_space<vmem>>, vector<8x32xf32>,
    %c0_59 = arith.constant 0 : index
    %c0_60 = arith.constant 0 : index
    %131 = vector.load %arg7[%c0_59, %c0_60] : memref<8x32xf32, #tpu.memory_space<vmem>>, vector<8x32xf32>
    tpu.vector_store %arg7[%c0_59, %c0_60], %129 {strides = array<i32>} : memref<8x32xf32, #tpu.memory_space<vmem>>, vector<8x32xf32>,
    %132 = arith.truncf %129 : vector<8x32xf32> to vector<8x32xbf16>
    %c0_61 = arith.constant 0 : index
    %133 = arith.index_cast %96 : i32 to index
    %c0_62 = arith.constant 0 : index
    %134 = vector.load %arg6[%c0_61, %133, %c0_62] : memref<1x64x32xbf16, #tpu.memory_space<vmem>>, vector<1x8x32xbf16>
    %135 = vector.shape_cast %134 : vector<1x8x32xbf16> to vector<8x32xbf16>
    %136 = vector.shape_cast %132 : vector<8x32xbf16> to vector<1x8x32xbf16>
    tpu.vector_store %arg6[%c0_61, %133, %c0_62], %136 {strides = array<i32>} : memref<1x64x32xbf16, #tpu.memory_space<vmem>>, vector<1x8x32xbf16>,
    %c3_i32 = arith.constant 3 : i32
    %c8_i32_63 = arith.constant 8 : i32
    %137 = arith.muli %c3_i32, %c8_i32_63 : i32
    %138 = tpu.assume_multiple %137, 8 : i32
    %139 = arith.index_cast %138 : i32 to index
    %c0_64 = arith.constant 0 : index
    %140 = vector.load %arg9[%139, %c0_64] : memref<64x128xf32, #tpu.memory_space<vmem>>, vector<8x128xf32>
    %c0_65 = arith.constant 0 : index
    %c0_66 = arith.constant 0 : index
    %141 = vector.load %arg7[%c0_65, %c0_66] : memref<8x32xf32, #tpu.memory_space<vmem>>, vector<8x32xf32>
    %142 = arith.truncf %141 : vector<8x32xf32> to vector<8x32xbf16>
    %c0_67 = arith.constant 0 : index
    %c0_68 = arith.constant 0 : index
    %143 = vector.load %arg4[%c0_67, %c0_68] : memref<32x128xbf16, #tpu.memory_space<vmem>>, vector<32x128xbf16>
    %cst_69 = arith.constant dense<0.000000e+00> : vector<8x128xf32>
    %144 = tpu.matmul %142, %143, %cst_69 {dimension_numbers = #tpu.dot_dimension_numbers<[1], [0], [0], [1], [0, 0, 1, 1], [], []>} : vector<8x32xbf16>, vector<32x128xbf16>, vector<8x128xf32> -> vector<8x128xf32>
    %145 = arith.addf %140, %144 : vector<8x128xf32>
    %146 = vector.extract_strided_slice %145 {offsets = [0, 0], sizes = [8, 32], strides = [1, 1]} : vector<8x128xf32> to vector<8x32xf32>
    %147 = arith.negf %146 : vector<8x32xf32>
    %148 = math.exp %147 : vector<8x32xf32>
    %cst_70 = arith.constant 1.000000e+00 : f32
    %149 = vector.broadcast %cst_70 : f32 to vector<8x32xf32>
    %150 = arith.addf %149, %148 : vector<8x32xf32>
    %151 = arith.divf %149, %150 : vector<8x32xf32>
    %152 = vector.extract_strided_slice %145 {offsets = [0, 32], sizes = [8, 32], strides = [1, 1]} : vector<8x128xf32> to vector<8x32xf32>
    %153 = arith.negf %152 : vector<8x32xf32>
    %154 = math.exp %153 : vector<8x32xf32>
    %cst_71 = arith.constant 1.000000e+00 : f32
    %155 = vector.broadcast %cst_71 : f32 to vector<8x32xf32>
    %156 = arith.addf %155, %154 : vector<8x32xf32>
    %157 = arith.divf %155, %156 : vector<8x32xf32>
    %158 = vector.extract_strided_slice %145 {offsets = [0, 64], sizes = [8, 32], strides = [1, 1]} : vector<8x128xf32> to vector<8x32xf32>
    %159 = math.tanh %158 : vector<8x32xf32>
    %160 = vector.extract_strided_slice %145 {offsets = [0, 96], sizes = [8, 32], strides = [1, 1]} : vector<8x128xf32> to vector<8x32xf32>
    %161 = arith.negf %160 : vector<8x32xf32>
    %162 = math.exp %161 : vector<8x32xf32>
    %cst_72 = arith.constant 1.000000e+00 : f32
    %163 = vector.broadcast %cst_72 : f32 to vector<8x32xf32>
    %164 = arith.addf %163, %162 : vector<8x32xf32>
    %165 = arith.divf %163, %164 : vector<8x32xf32>
    %c0_73 = arith.constant 0 : index
    %c0_74 = arith.constant 0 : index
    %166 = vector.load %arg8[%c0_73, %c0_74] : memref<8x32xf32, #tpu.memory_space<vmem>>, vector<8x32xf32>
    %167 = arith.mulf %157, %166 : vector<8x32xf32>
    %168 = arith.mulf %151, %159 : vector<8x32xf32>
    %169 = arith.addf %167, %168 : vector<8x32xf32>
    %170 = math.tanh %169 : vector<8x32xf32>
    %171 = arith.mulf %165, %170 : vector<8x32xf32>
    %c0_75 = arith.constant 0 : index
    %c0_76 = arith.constant 0 : index
    %172 = vector.load %arg8[%c0_75, %c0_76] : memref<8x32xf32, #tpu.memory_space<vmem>>, vector<8x32xf32>
    tpu.vector_store %arg8[%c0_75, %c0_76], %169 {strides = array<i32>} : memref<8x32xf32, #tpu.memory_space<vmem>>, vector<8x32xf32>,
    %c0_77 = arith.constant 0 : index
    %c0_78 = arith.constant 0 : index
    %173 = vector.load %arg7[%c0_77, %c0_78] : memref<8x32xf32, #tpu.memory_space<vmem>>, vector<8x32xf32>
    tpu.vector_store %arg7[%c0_77, %c0_78], %171 {strides = array<i32>} : memref<8x32xf32, #tpu.memory_space<vmem>>, vector<8x32xf32>,
    %174 = arith.truncf %171 : vector<8x32xf32> to vector<8x32xbf16>
    %c0_79 = arith.constant 0 : index
    %175 = arith.index_cast %138 : i32 to index
    %c0_80 = arith.constant 0 : index
    %176 = vector.load %arg6[%c0_79, %175, %c0_80] : memref<1x64x32xbf16, #tpu.memory_space<vmem>>, vector<1x8x32xbf16>
    %177 = vector.shape_cast %176 : vector<1x8x32xbf16> to vector<8x32xbf16>
    %178 = vector.shape_cast %174 : vector<8x32xbf16> to vector<1x8x32xbf16>
    tpu.vector_store %arg6[%c0_79, %175, %c0_80], %178 {strides = array<i32>} : memref<1x64x32xbf16, #tpu.memory_space<vmem>>, vector<1x8x32xbf16>,
    %c4_i32 = arith.constant 4 : i32
    %c8_i32_81 = arith.constant 8 : i32
    %179 = arith.muli %c4_i32, %c8_i32_81 : i32
    %180 = tpu.assume_multiple %179, 8 : i32
    %181 = arith.index_cast %180 : i32 to index
    %c0_82 = arith.constant 0 : index
    %182 = vector.load %arg9[%181, %c0_82] : memref<64x128xf32, #tpu.memory_space<vmem>>, vector<8x128xf32>
    %c0_83 = arith.constant 0 : index
    %c0_84 = arith.constant 0 : index
    %183 = vector.load %arg7[%c0_83, %c0_84] : memref<8x32xf32, #tpu.memory_space<vmem>>, vector<8x32xf32>
    %184 = arith.truncf %183 : vector<8x32xf32> to vector<8x32xbf16>
    %c0_85 = arith.constant 0 : index
    %c0_86 = arith.constant 0 : index
    %185 = vector.load %arg4[%c0_85, %c0_86] : memref<32x128xbf16, #tpu.memory_space<vmem>>, vector<32x128xbf16>
    %cst_87 = arith.constant dense<0.000000e+00> : vector<8x128xf32>
    %186 = tpu.matmul %184, %185, %cst_87 {dimension_numbers = #tpu.dot_dimension_numbers<[1], [0], [0], [1], [0, 0, 1, 1], [], []>} : vector<8x32xbf16>, vector<32x128xbf16>, vector<8x128xf32> -> vector<8x128xf32>
    %187 = arith.addf %182, %186 : vector<8x128xf32>
    %188 = vector.extract_strided_slice %187 {offsets = [0, 0], sizes = [8, 32], strides = [1, 1]} : vector<8x128xf32> to vector<8x32xf32>
    %189 = arith.negf %188 : vector<8x32xf32>
    %190 = math.exp %189 : vector<8x32xf32>
    %cst_88 = arith.constant 1.000000e+00 : f32
    %191 = vector.broadcast %cst_88 : f32 to vector<8x32xf32>
    %192 = arith.addf %191, %190 : vector<8x32xf32>
    %193 = arith.divf %191, %192 : vector<8x32xf32>
    %194 = vector.extract_strided_slice %187 {offsets = [0, 32], sizes = [8, 32], strides = [1, 1]} : vector<8x128xf32> to vector<8x32xf32>
    %195 = arith.negf %194 : vector<8x32xf32>
    %196 = math.exp %195 : vector<8x32xf32>
    %cst_89 = arith.constant 1.000000e+00 : f32
    %197 = vector.broadcast %cst_89 : f32 to vector<8x32xf32>
    %198 = arith.addf %197, %196 : vector<8x32xf32>
    %199 = arith.divf %197, %198 : vector<8x32xf32>
    %200 = vector.extract_strided_slice %187 {offsets = [0, 64], sizes = [8, 32], strides = [1, 1]} : vector<8x128xf32> to vector<8x32xf32>
    %201 = math.tanh %200 : vector<8x32xf32>
    %202 = vector.extract_strided_slice %187 {offsets = [0, 96], sizes = [8, 32], strides = [1, 1]} : vector<8x128xf32> to vector<8x32xf32>
    %203 = arith.negf %202 : vector<8x32xf32>
    %204 = math.exp %203 : vector<8x32xf32>
    %cst_90 = arith.constant 1.000000e+00 : f32
    %205 = vector.broadcast %cst_90 : f32 to vector<8x32xf32>
    %206 = arith.addf %205, %204 : vector<8x32xf32>
    %207 = arith.divf %205, %206 : vector<8x32xf32>
    %c0_91 = arith.constant 0 : index
    %c0_92 = arith.constant 0 : index
    %208 = vector.load %arg8[%c0_91, %c0_92] : memref<8x32xf32, #tpu.memory_space<vmem>>, vector<8x32xf32>
    %209 = arith.mulf %199, %208 : vector<8x32xf32>
    %210 = arith.mulf %193, %201 : vector<8x32xf32>
    %211 = arith.addf %209, %210 : vector<8x32xf32>
    %212 = math.tanh %211 : vector<8x32xf32>
    %213 = arith.mulf %207, %212 : vector<8x32xf32>
    %c0_93 = arith.constant 0 : index
    %c0_94 = arith.constant 0 : index
    %214 = vector.load %arg8[%c0_93, %c0_94] : memref<8x32xf32, #tpu.memory_space<vmem>>, vector<8x32xf32>
    tpu.vector_store %arg8[%c0_93, %c0_94], %211 {strides = array<i32>} : memref<8x32xf32, #tpu.memory_space<vmem>>, vector<8x32xf32>,
    %c0_95 = arith.constant 0 : index
    %c0_96 = arith.constant 0 : index
    %215 = vector.load %arg7[%c0_95, %c0_96] : memref<8x32xf32, #tpu.memory_space<vmem>>, vector<8x32xf32>
    tpu.vector_store %arg7[%c0_95, %c0_96], %213 {strides = array<i32>} : memref<8x32xf32, #tpu.memory_space<vmem>>, vector<8x32xf32>,
    %216 = arith.truncf %213 : vector<8x32xf32> to vector<8x32xbf16>
    %c0_97 = arith.constant 0 : index
    %217 = arith.index_cast %180 : i32 to index
    %c0_98 = arith.constant 0 : index
    %218 = vector.load %arg6[%c0_97, %217, %c0_98] : memref<1x64x32xbf16, #tpu.memory_space<vmem>>, vector<1x8x32xbf16>
    %219 = vector.shape_cast %218 : vector<1x8x32xbf16> to vector<8x32xbf16>
    %220 = vector.shape_cast %216 : vector<8x32xbf16> to vector<1x8x32xbf16>
    tpu.vector_store %arg6[%c0_97, %217, %c0_98], %220 {strides = array<i32>} : memref<1x64x32xbf16, #tpu.memory_space<vmem>>, vector<1x8x32xbf16>,
    %c5_i32 = arith.constant 5 : i32
    %c8_i32_99 = arith.constant 8 : i32
    %221 = arith.muli %c5_i32, %c8_i32_99 : i32
    %222 = tpu.assume_multiple %221, 8 : i32
    %223 = arith.index_cast %222 : i32 to index
    %c0_100 = arith.constant 0 : index
    %224 = vector.load %arg9[%223, %c0_100] : memref<64x128xf32, #tpu.memory_space<vmem>>, vector<8x128xf32>
    %c0_101 = arith.constant 0 : index
    %c0_102 = arith.constant 0 : index
    %225 = vector.load %arg7[%c0_101, %c0_102] : memref<8x32xf32, #tpu.memory_space<vmem>>, vector<8x32xf32>
    %226 = arith.truncf %225 : vector<8x32xf32> to vector<8x32xbf16>
    %c0_103 = arith.constant 0 : index
    %c0_104 = arith.constant 0 : index
    %227 = vector.load %arg4[%c0_103, %c0_104] : memref<32x128xbf16, #tpu.memory_space<vmem>>, vector<32x128xbf16>
    %cst_105 = arith.constant dense<0.000000e+00> : vector<8x128xf32>
    %228 = tpu.matmul %226, %227, %cst_105 {dimension_numbers = #tpu.dot_dimension_numbers<[1], [0], [0], [1], [0, 0, 1, 1], [], []>} : vector<8x32xbf16>, vector<32x128xbf16>, vector<8x128xf32> -> vector<8x128xf32>
    %229 = arith.addf %224, %228 : vector<8x128xf32>
    %230 = vector.extract_strided_slice %229 {offsets = [0, 0], sizes = [8, 32], strides = [1, 1]} : vector<8x128xf32> to vector<8x32xf32>
    %231 = arith.negf %230 : vector<8x32xf32>
    %232 = math.exp %231 : vector<8x32xf32>
    %cst_106 = arith.constant 1.000000e+00 : f32
    %233 = vector.broadcast %cst_106 : f32 to vector<8x32xf32>
    %234 = arith.addf %233, %232 : vector<8x32xf32>
    %235 = arith.divf %233, %234 : vector<8x32xf32>
    %236 = vector.extract_strided_slice %229 {offsets = [0, 32], sizes = [8, 32], strides = [1, 1]} : vector<8x128xf32> to vector<8x32xf32>
    %237 = arith.negf %236 : vector<8x32xf32>
    %238 = math.exp %237 : vector<8x32xf32>
    %cst_107 = arith.constant 1.000000e+00 : f32
    %239 = vector.broadcast %cst_107 : f32 to vector<8x32xf32>
    %240 = arith.addf %239, %238 : vector<8x32xf32>
    %241 = arith.divf %239, %240 : vector<8x32xf32>
    %242 = vector.extract_strided_slice %229 {offsets = [0, 64], sizes = [8, 32], strides = [1, 1]} : vector<8x128xf32> to vector<8x32xf32>
    %243 = math.tanh %242 : vector<8x32xf32>
    %244 = vector.extract_strided_slice %229 {offsets = [0, 96], sizes = [8, 32], strides = [1, 1]} : vector<8x128xf32> to vector<8x32xf32>
    %245 = arith.negf %244 : vector<8x32xf32>
    %246 = math.exp %245 : vector<8x32xf32>
    %cst_108 = arith.constant 1.000000e+00 : f32
    %247 = vector.broadcast %cst_108 : f32 to vector<8x32xf32>
    %248 = arith.addf %247, %246 : vector<8x32xf32>
    %249 = arith.divf %247, %248 : vector<8x32xf32>
    %c0_109 = arith.constant 0 : index
    %c0_110 = arith.constant 0 : index
    %250 = vector.load %arg8[%c0_109, %c0_110] : memref<8x32xf32, #tpu.memory_space<vmem>>, vector<8x32xf32>
    %251 = arith.mulf %241, %250 : vector<8x32xf32>
    %252 = arith.mulf %235, %243 : vector<8x32xf32>
    %253 = arith.addf %251, %252 : vector<8x32xf32>
    %254 = math.tanh %253 : vector<8x32xf32>
    %255 = arith.mulf %249, %254 : vector<8x32xf32>
    %c0_111 = arith.constant 0 : index
    %c0_112 = arith.constant 0 : index
    %256 = vector.load %arg8[%c0_111, %c0_112] : memref<8x32xf32, #tpu.memory_space<vmem>>, vector<8x32xf32>
    tpu.vector_store %arg8[%c0_111, %c0_112], %253 {strides = array<i32>} : memref<8x32xf32, #tpu.memory_space<vmem>>, vector<8x32xf32>,
    %c0_113 = arith.constant 0 : index
    %c0_114 = arith.constant 0 : index
    %257 = vector.load %arg7[%c0_113, %c0_114] : memref<8x32xf32, #tpu.memory_space<vmem>>, vector<8x32xf32>
    tpu.vector_store %arg7[%c0_113, %c0_114], %255 {strides = array<i32>} : memref<8x32xf32, #tpu.memory_space<vmem>>, vector<8x32xf32>,
    %258 = arith.truncf %255 : vector<8x32xf32> to vector<8x32xbf16>
    %c0_115 = arith.constant 0 : index
    %259 = arith.index_cast %222 : i32 to index
    %c0_116 = arith.constant 0 : index
    %260 = vector.load %arg6[%c0_115, %259, %c0_116] : memref<1x64x32xbf16, #tpu.memory_space<vmem>>, vector<1x8x32xbf16>
    %261 = vector.shape_cast %260 : vector<1x8x32xbf16> to vector<8x32xbf16>
    %262 = vector.shape_cast %258 : vector<8x32xbf16> to vector<1x8x32xbf16>
    tpu.vector_store %arg6[%c0_115, %259, %c0_116], %262 {strides = array<i32>} : memref<1x64x32xbf16, #tpu.memory_space<vmem>>, vector<1x8x32xbf16>,
    %c6_i32 = arith.constant 6 : i32
    %c8_i32_117 = arith.constant 8 : i32
    %263 = arith.muli %c6_i32, %c8_i32_117 : i32
    %264 = tpu.assume_multiple %263, 8 : i32
    %265 = arith.index_cast %264 : i32 to index
    %c0_118 = arith.constant 0 : index
    %266 = vector.load %arg9[%265, %c0_118] : memref<64x128xf32, #tpu.memory_space<vmem>>, vector<8x128xf32>
    %c0_119 = arith.constant 0 : index
    %c0_120 = arith.constant 0 : index
    %267 = vector.load %arg7[%c0_119, %c0_120] : memref<8x32xf32, #tpu.memory_space<vmem>>, vector<8x32xf32>
    %268 = arith.truncf %267 : vector<8x32xf32> to vector<8x32xbf16>
    %c0_121 = arith.constant 0 : index
    %c0_122 = arith.constant 0 : index
    %269 = vector.load %arg4[%c0_121, %c0_122] : memref<32x128xbf16, #tpu.memory_space<vmem>>, vector<32x128xbf16>
    %cst_123 = arith.constant dense<0.000000e+00> : vector<8x128xf32>
    %270 = tpu.matmul %268, %269, %cst_123 {dimension_numbers = #tpu.dot_dimension_numbers<[1], [0], [0], [1], [0, 0, 1, 1], [], []>} : vector<8x32xbf16>, vector<32x128xbf16>, vector<8x128xf32> -> vector<8x128xf32>
    %271 = arith.addf %266, %270 : vector<8x128xf32>
    %272 = vector.extract_strided_slice %271 {offsets = [0, 0], sizes = [8, 32], strides = [1, 1]} : vector<8x128xf32> to vector<8x32xf32>
    %273 = arith.negf %272 : vector<8x32xf32>
    %274 = math.exp %273 : vector<8x32xf32>
    %cst_124 = arith.constant 1.000000e+00 : f32
    %275 = vector.broadcast %cst_124 : f32 to vector<8x32xf32>
    %276 = arith.addf %275, %274 : vector<8x32xf32>
    %277 = arith.divf %275, %276 : vector<8x32xf32>
    %278 = vector.extract_strided_slice %271 {offsets = [0, 32], sizes = [8, 32], strides = [1, 1]} : vector<8x128xf32> to vector<8x32xf32>
    %279 = arith.negf %278 : vector<8x32xf32>
    %280 = math.exp %279 : vector<8x32xf32>
    %cst_125 = arith.constant 1.000000e+00 : f32
    %281 = vector.broadcast %cst_125 : f32 to vector<8x32xf32>
    %282 = arith.addf %281, %280 : vector<8x32xf32>
    %283 = arith.divf %281, %282 : vector<8x32xf32>
    %284 = vector.extract_strided_slice %271 {offsets = [0, 64], sizes = [8, 32], strides = [1, 1]} : vector<8x128xf32> to vector<8x32xf32>
    %285 = math.tanh %284 : vector<8x32xf32>
    %286 = vector.extract_strided_slice %271 {offsets = [0, 96], sizes = [8, 32], strides = [1, 1]} : vector<8x128xf32> to vector<8x32xf32>
    %287 = arith.negf %286 : vector<8x32xf32>
    %288 = math.exp %287 : vector<8x32xf32>
    %cst_126 = arith.constant 1.000000e+00 : f32
    %289 = vector.broadcast %cst_126 : f32 to vector<8x32xf32>
    %290 = arith.addf %289, %288 : vector<8x32xf32>
    %291 = arith.divf %289, %290 : vector<8x32xf32>
    %c0_127 = arith.constant 0 : index
    %c0_128 = arith.constant 0 : index
    %292 = vector.load %arg8[%c0_127, %c0_128] : memref<8x32xf32, #tpu.memory_space<vmem>>, vector<8x32xf32>
    %293 = arith.mulf %283, %292 : vector<8x32xf32>
    %294 = arith.mulf %277, %285 : vector<8x32xf32>
    %295 = arith.addf %293, %294 : vector<8x32xf32>
    %296 = math.tanh %295 : vector<8x32xf32>
    %297 = arith.mulf %291, %296 : vector<8x32xf32>
    %c0_129 = arith.constant 0 : index
    %c0_130 = arith.constant 0 : index
    %298 = vector.load %arg8[%c0_129, %c0_130] : memref<8x32xf32, #tpu.memory_space<vmem>>, vector<8x32xf32>
    tpu.vector_store %arg8[%c0_129, %c0_130], %295 {strides = array<i32>} : memref<8x32xf32, #tpu.memory_space<vmem>>, vector<8x32xf32>,
    %c0_131 = arith.constant 0 : index
    %c0_132 = arith.constant 0 : index
    %299 = vector.load %arg7[%c0_131, %c0_132] : memref<8x32xf32, #tpu.memory_space<vmem>>, vector<8x32xf32>
    tpu.vector_store %arg7[%c0_131, %c0_132], %297 {strides = array<i32>} : memref<8x32xf32, #tpu.memory_space<vmem>>, vector<8x32xf32>,
    %300 = arith.truncf %297 : vector<8x32xf32> to vector<8x32xbf16>
    %c0_133 = arith.constant 0 : index
    %301 = arith.index_cast %264 : i32 to index
    %c0_134 = arith.constant 0 : index
    %302 = vector.load %arg6[%c0_133, %301, %c0_134] : memref<1x64x32xbf16, #tpu.memory_space<vmem>>, vector<1x8x32xbf16>
    %303 = vector.shape_cast %302 : vector<1x8x32xbf16> to vector<8x32xbf16>
    %304 = vector.shape_cast %300 : vector<8x32xbf16> to vector<1x8x32xbf16>
    tpu.vector_store %arg6[%c0_133, %301, %c0_134], %304 {strides = array<i32>} : memref<1x64x32xbf16, #tpu.memory_space<vmem>>, vector<1x8x32xbf16>,
    %c7_i32 = arith.constant 7 : i32
    %c8_i32_135 = arith.constant 8 : i32
    %305 = arith.muli %c7_i32, %c8_i32_135 : i32
    %306 = tpu.assume_multiple %305, 8 : i32
    %307 = arith.index_cast %306 : i32 to index
    %c0_136 = arith.constant 0 : index
    %308 = vector.load %arg9[%307, %c0_136] : memref<64x128xf32, #tpu.memory_space<vmem>>, vector<8x128xf32>
    %c0_137 = arith.constant 0 : index
    %c0_138 = arith.constant 0 : index
    %309 = vector.load %arg7[%c0_137, %c0_138] : memref<8x32xf32, #tpu.memory_space<vmem>>, vector<8x32xf32>
    %310 = arith.truncf %309 : vector<8x32xf32> to vector<8x32xbf16>
    %c0_139 = arith.constant 0 : index
    %c0_140 = arith.constant 0 : index
    %311 = vector.load %arg4[%c0_139, %c0_140] : memref<32x128xbf16, #tpu.memory_space<vmem>>, vector<32x128xbf16>
    %cst_141 = arith.constant dense<0.000000e+00> : vector<8x128xf32>
    %312 = tpu.matmul %310, %311, %cst_141 {dimension_numbers = #tpu.dot_dimension_numbers<[1], [0], [0], [1], [0, 0, 1, 1], [], []>} : vector<8x32xbf16>, vector<32x128xbf16>, vector<8x128xf32> -> vector<8x128xf32>
    %313 = arith.addf %308, %312 : vector<8x128xf32>
    %314 = vector.extract_strided_slice %313 {offsets = [0, 0], sizes = [8, 32], strides = [1, 1]} : vector<8x128xf32> to vector<8x32xf32>
    %315 = arith.negf %314 : vector<8x32xf32>
    %316 = math.exp %315 : vector<8x32xf32>
    %cst_142 = arith.constant 1.000000e+00 : f32
    %317 = vector.broadcast %cst_142 : f32 to vector<8x32xf32>
    %318 = arith.addf %317, %316 : vector<8x32xf32>
    %319 = arith.divf %317, %318 : vector<8x32xf32>
    %320 = vector.extract_strided_slice %313 {offsets = [0, 32], sizes = [8, 32], strides = [1, 1]} : vector<8x128xf32> to vector<8x32xf32>
    %321 = arith.negf %320 : vector<8x32xf32>
    %322 = math.exp %321 : vector<8x32xf32>
    %cst_143 = arith.constant 1.000000e+00 : f32
    %323 = vector.broadcast %cst_143 : f32 to vector<8x32xf32>
    %324 = arith.addf %323, %322 : vector<8x32xf32>
    %325 = arith.divf %323, %324 : vector<8x32xf32>
    %326 = vector.extract_strided_slice %313 {offsets = [0, 64], sizes = [8, 32], strides = [1, 1]} : vector<8x128xf32> to vector<8x32xf32>
    %327 = math.tanh %326 : vector<8x32xf32>
    %328 = vector.extract_strided_slice %313 {offsets = [0, 96], sizes = [8, 32], strides = [1, 1]} : vector<8x128xf32> to vector<8x32xf32>
    %329 = arith.negf %328 : vector<8x32xf32>
    %330 = math.exp %329 : vector<8x32xf32>
    %cst_144 = arith.constant 1.000000e+00 : f32
    %331 = vector.broadcast %cst_144 : f32 to vector<8x32xf32>
    %332 = arith.addf %331, %330 : vector<8x32xf32>
    %333 = arith.divf %331, %332 : vector<8x32xf32>
    %c0_145 = arith.constant 0 : index
    %c0_146 = arith.constant 0 : index
    %334 = vector.load %arg8[%c0_145, %c0_146] : memref<8x32xf32, #tpu.memory_space<vmem>>, vector<8x32xf32>
    %335 = arith.mulf %325, %334 : vector<8x32xf32>
    %336 = arith.mulf %319, %327 : vector<8x32xf32>
    %337 = arith.addf %335, %336 : vector<8x32xf32>
    %338 = math.tanh %337 : vector<8x32xf32>
    %339 = arith.mulf %333, %338 : vector<8x32xf32>
    %c0_147 = arith.constant 0 : index
    %c0_148 = arith.constant 0 : index
    %340 = vector.load %arg8[%c0_147, %c0_148] : memref<8x32xf32, #tpu.memory_space<vmem>>, vector<8x32xf32>
    tpu.vector_store %arg8[%c0_147, %c0_148], %337 {strides = array<i32>} : memref<8x32xf32, #tpu.memory_space<vmem>>, vector<8x32xf32>,
    %c0_149 = arith.constant 0 : index
    %c0_150 = arith.constant 0 : index
    %341 = vector.load %arg7[%c0_149, %c0_150] : memref<8x32xf32, #tpu.memory_space<vmem>>, vector<8x32xf32>
    tpu.vector_store %arg7[%c0_149, %c0_150], %339 {strides = array<i32>} : memref<8x32xf32, #tpu.memory_space<vmem>>, vector<8x32xf32>,
    %342 = arith.truncf %339 : vector<8x32xf32> to vector<8x32xbf16>
    %c0_151 = arith.constant 0 : index
    %343 = arith.index_cast %306 : i32 to index
    %c0_152 = arith.constant 0 : index
    %344 = vector.load %arg6[%c0_151, %343, %c0_152] : memref<1x64x32xbf16, #tpu.memory_space<vmem>>, vector<1x8x32xbf16>
    %345 = vector.shape_cast %344 : vector<1x8x32xbf16> to vector<8x32xbf16>
    %346 = vector.shape_cast %342 : vector<8x32xbf16> to vector<1x8x32xbf16>
    tpu.vector_store %arg6[%c0_151, %343, %c0_152], %346 {strides = array<i32>} : memref<1x64x32xbf16, #tpu.memory_space<vmem>>, vector<1x8x32xbf16>,
    %c8_i32_153 = arith.constant 8 : i32
    return
  }
  func.func @transform_0(%arg0: i32, %arg1: i32) -> (i32, i32, i32) {
    %c0_i32 = arith.constant 0 : i32
    %c0_i32_0 = arith.constant 0 : i32
    return %arg0, %arg1, %c0_i32 : i32, i32, i32
  }
  func.func @transform_1(%arg0: i32, %arg1: i32) -> (i32, i32) {
    %c0_i32 = arith.constant 0 : i32
    %c0_i32_0 = arith.constant 0 : i32
    %c0_i32_1 = arith.constant 0 : i32
    return %c0_i32, %c0_i32_0 : i32, i32
  }
  func.func @transform_2(%arg0: i32, %arg1: i32) -> (i32, i32) {
    %c0_i32 = arith.constant 0 : i32
    %c0_i32_0 = arith.constant 0 : i32
    %c0_i32_1 = arith.constant 0 : i32
    return %c0_i32, %c0_i32_0 : i32, i32
  }
  func.func @transform_3(%arg0: i32, %arg1: i32) -> (i32, i32) {
    %c0_i32 = arith.constant 0 : i32
    %c0_i32_0 = arith.constant 0 : i32
    %c0_i32_1 = arith.constant 0 : i32
    return %c0_i32, %c0_i32_0 : i32, i32
  }
  func.func @transform_4(%arg0: i32, %arg1: i32) -> (i32, i32, i32) {
    %c0_i32 = arith.constant 0 : i32
    %c0_i32_0 = arith.constant 0 : i32
    return %arg0, %arg1, %c0_i32 : i32, i32, i32
  }
}

</mosaic_0001>

<bundles_post_ra>
// kernel: tpu_custom_call.1
= control target key start
LH: loop header
LB: loop body
LE: loop exit
PB: predicated region body
PF: predicated region fallthrough
CT: control target
= control target key end

     0   :  { %vm22_vm0 = vcmask 261120   ;;  %v1324_v0 = vmov 0.0   ;;  %vm1325_vm1 = vmmov 0   ;;  %s1326_s28 = smov 64   ;;  %s1327_s29 = smov 32   ;;  %vm271_vm2 = vcmask 257024   ;;  %s1633_s1 = inlined_call_operand.vmem [shape: bf16[32,128], index: 1, kind: input, shape index: {}]   ;;  %s1634_s2 = inlined_call_operand.vmem [shape: bf16[32,128], index: 2, kind: input, shape index: {}]   ;;  %s1635_s0 = inlined_call_operand.vmem [shape: bf16[1,64,32], index: 0, kind: input, shape index: {}]   ;;  %s1636_s3 = inlined_call_operand.vmem [shape: f32[1,128], index: 3, kind: input, shape index: {}]   ;;  %s1637_s4 = inlined_call_operand.vmem [shape: bf16[1,64,32], index: 4, kind: output, shape index: {}]  }
   0x1   :  { %1169 = vmatprep.subr.bf16.mxu1 %v1324_v0  ;;  %v1238_v1 = vld [vmem:[%s1633_s1 + $0x8] sm:$0xff]   ;;  %1173 = vmatprep.mubr.msk.bf16.mxu1 %vm1325_vm1, %v1324_v0  ;;  %23 = vst.msk [vmem:[#allocation2] sm:$0xff] %vm22_vm0, %v1324_v0  ;;  %24 = vst.msk [vmem:[#allocation3] sm:$0xff] %vm22_vm0, %v1324_v0  ;;  %v1240_v3 = vld [vmem:[%s1633_s1] sm:$0xff]  }
   0x2   :  { %v1239_v2 = vld [vmem:[%s1634_s2 + $0x8] sm:$0xff]   ;;  %1157 = vmatprep.subr.bf16.mxu0 %v1238_v1  ;;  %v1241_v4 = vld [vmem:[%s1634_s2] sm:$0xff]   ;;  %v1247_v61 = vld [vmem:[%s1635_s0 + $0x10] sm:$0xff]  }
   0x3   :  { %1170 = vmatpush3.bf16.msra.mxu1 %v1239_v2  ;;  %1158 = vmatpush3.bf16.msra.mxu0 %v1238_v1  ;;  %v1242_v5 = vld [vmem:[%s1635_s0] sm:$0xff]   ;;  %v1243_v6 = vld [vmem:[%s1635_s0 + $0x8] sm:$0xff]   ;;  %v1248_v62 = vld [vmem:[%s1635_s0 + $0x18] sm:$0xff]  }
   0x4   :  { %1171 = vmatprep.subr.bf16.mxu1 %v1324_v0  ;;  %1159 = vmatprep.subr.bf16.mxu0 %v1240_v3  ;;  %v1392_v11 = vld [vmem:[%s1636_s3] ss:$0 sm:$0xff]  ;;  %s1328_s3 = smov 96   ;;  %v1244_v31 = vld [vmem:[%s1634_s2 + $0x8] sm:$0xff]  }
   0x5   :  { %1161 = vmatprep.mubr.msk.bf16.mxu0 %vm22_vm0, %v1242_v5  ;;  %v1245_v32 = vld [vmem:[%s1634_s2] sm:$0xff]   ;;  %v1246_v60 = vld [vmem:[%s1634_s2 + $0x8] sm:$0xff]  }
   0x6   :  { %v1249_v63 = vld [vmem:[%s1634_s2] sm:$0xff]  }
   0x7   :  { %1172 = vmatpush3.bf16.msra.mxu1 %v1241_v4  ;;  %1160 = vmatpush3.bf16.msra.mxu0 %v1240_v3 }
   0x8   :  { %v163_v7 = vld [vmem:[#allocation2] sm:$0xff]  ;;  %1177 = vmatprep.subr.bf16.mxu1 %v1324_v0  ;;  %1185 = vmatprep.subr.bf16.mxu0 %v1324_v0  ;;  %v232_v19 = vld [vmem:[#allocation3] sm:$0xff] }
   0x9   :  { %v164_v8 = vpack.c.bf16 %v163_v7, %v163_v7 }
   0xa   :  { %1162 = vmatmul.mubr.msk.bf16.vlgmr.msra.gmra.mxu0 %vm22_vm0, %v1243_v6 }
   0xb   :  { %1174 = vmatmul.mubr.msk.bf16.vlgmr.msra.gmra.mxu1 %vm22_vm0, %v164_v8  ;;  %1186 = vmatpush3.bf16.msra.mxu0 %v1246_v60  ;;  %v1253_v60 = vld [vmem:[%s1634_s2] sm:$0xff]  }
   0xc   :  { %1181 = vmatprep.mubr.msk.bf16.mxu1 %vm1325_vm1, %v1324_v0  ;;  %1178 = vmatpush3.bf16.msra.mxu1 %v1244_v31  ;;  %v1250_v31 = vld [vmem:[%s1634_s2 + $0x8] sm:$0xff]  }
   0xd   :  { %1179 = vmatprep.subr.bf16.mxu1 %v1324_v0  ;;  %1165 = vmatprep.mubr.msk.bf16.mxu0 %vm22_vm0, %v1247_v61 }
   0xe   :  { %1187 = vmatprep.subr.bf16.mxu0 %v1324_v0 }
   0xf   :  { %1188 = vmatpush3.bf16.msra.mxu0 %v1249_v63 }
  0x10   :  { %1180 = vmatpush3.bf16.msra.mxu1 %v1245_v32  ;;  %1201 = vmatprep.subr.bf16.mxu0 %v1324_v0  ;;  %v1251_v32 = vld [vmem:[%s1634_s2] sm:$0xff]  }
  0x11   :  { %1193 = vmatprep.subr.bf16.mxu1 %v1324_v0 }
  0x12   :  { %1166 = vmatmul.mubr.msk.bf16.gmra.mxu0 %vm22_vm0, %v1248_v62 }
  0x13   :  { %1189 = vmatprep.mubr.msk.bf16.mxu0 %vm1325_vm1, %v1324_v0 }
  0xca   :  { %v1387_v10 = vpop.f32.mrf.mxu0 }
  0xcb   :  { %v218_v9 = vpop.f32.mrf.mxu1 }
  0xcc   :  { %v123_v13 = vpop.f32.mrf.mxu0 }
  0xcd   :  { %v1175_v12 = vpop.f32.mrf.mxu1  ;;  %v124_v14 = vadd.f32 %v1392_v11, %v123_v13 }
  0xce   :  { %v1418_v40 = vpop.f32.mrf.mxu0 }
  0xcf   :  { %v221_v15 = vpop.f32.mrf.mxu1  ;;  %v224_v16 = vadd.f32 %v218_v9, %v124_v14  ;;  %v132_v14 = vadd.f32 %v1387_v10, %v1392_v11 }
  0xd0   :  { %v126_v41 = vpop.f32.mrf.mxu0 }
  0xd1   :  { %v1176_v17 = vpop.f32.mrf.mxu1  ;;  %1260 = vtanh.f32 %v224_v16  ;;  %v1075_v20 = vmul.f32 -1.442695, %v224_v16  ;;  %v127_v42 = vadd.f32 %v1392_v11, %v126_v41 }
  0xd2   :  { %v1453_v8 = vpop.f32.mrf.mxu0 }
  0xd3   :  { %1262 = vpow2.f32 %v1075_v20 }
  0xd4   :  { %v1455_v9 = vpop.f32.mrf.mxu0 }
  0xd6   :  { %v1457_v12 = vpop.f32.mrf.mxu0 }
  0xd8   :  { %v1459_v13 = vpop.f32.mrf.mxu0 }
  0xde   :  { %v1261_v18 = vpop.eup %1260 }
  0xdf   :  { %239 = vrot.lane.b32.xlu0 %v1261_v18, %s1326_s28 }
  0xe0   :  { %v1263_v21 = vpop.eup %1262 }
  0xe1   :  { %v228_v22 = vadd.f32 1.0, %v1263_v21 }
  0xe3   :  { %234 = vrot.lane.b32.xlu0 %v232_v19, %s1327_s29  ;;  %1264 = vrcp.f32 %v228_v22 }
  0xf0   :  { %v1265_v23 = vpop.eup %1264 }
 0x151   :  { %v240_v24 = vpop.permute.xlu0 %239 }
 0x152   :  { %v242_v25 = vmul.f32 %v1265_v23, %v240_v24 }
 0x154   :  { %244 = vrot.lane.b32.xlu1 %v242_v25, %s1327_s29 }
 0x155   :  { %v235_v26 = vpop.permute.xlu0 %234 }
 0x156   :  { %v237_v27 = vmul.f32 %v1265_v23, %v235_v26 }
 0x1c6   :  { %v245_v28 = vpop.permute.xlu1 %244 }
 0x1c7   :  { %v247_v29 = vadd.f32 %v245_v28, %v237_v27 }
 0x1c9   :  { %1266 = vtanh.f32 %v247_v29 }
 0x1d6   :  { %v1267_v30 = vpop.eup %1266 }
 0x1d7   :  { %250 = vrot.lane.b32.xlu1 %v1267_v30, %s1326_s28 }
 0x1db   :  { %255 = vrot.lane.b32.xlu1 %v247_v29, %s1328_s3 }
 0x249   :  { %v251_v33 = vpop.permute.xlu1 %250 }
 0x24a   :  { %v1408_v34 = vmul.f32 %v1265_v23, %v251_v33 }
 0x24c   :  { %260 = vrot.lane.b32.xlu0 %v1408_v34, %s1327_s29 }
 0x24d   :  { %v256_v35 = vpop.permute.xlu1 %255 }
 0x24e   :  { %258 = vst.msk [vmem:[#allocation3] sm:$0xff] %vm22_vm0, %v256_v35 }
 0x255   :  { %v344_v36 = vld [vmem:[#allocation3] sm:$0xff] }
 0x256   :  { %346 = vrot.lane.b32.xlu1 %v344_v36, %s1327_s29 }
 0x2be   :  { %v261_v37 = vpop.permute.xlu0 %260 }
 0x2bf   :  { %263 = vst.msk [vmem:[#allocation2] sm:$0xff] %vm22_vm0, %v261_v37 }
 0x2c6   :  { %v275_v38 = vld [vmem:[#allocation2] sm:$0xff] }
 0x2c7   :  { %v276_v39 = vpack.c.bf16 %v275_v38, %v275_v38 }
 0x2c8   :  { %v347_v55 = vpop.permute.xlu1 %346 }
 0x2c9   :  { %1182 = vmatmul.mubr.msk.bf16.vlgmr.msra.gmra.mxu1 %vm22_vm0, %v276_v39 }
 0x2ca   :  { %1197 = vmatprep.mubr.msk.bf16.mxu1 %vm1325_vm1, %v1324_v0  ;;  %1194 = vmatpush3.bf16.msra.mxu1 %v1250_v31 }
 0x2cb   :  { %1195 = vmatprep.subr.bf16.mxu1 %v1324_v0 }
 0x2ce   :  { %1196 = vmatpush3.bf16.msra.mxu1 %v1251_v32 }
 0x2cf   :  { %1209 = vmatprep.subr.bf16.mxu1 %v1324_v0 }
 0x389   :  { %v330_v43 = vpop.f32.mrf.mxu1 }
 0x38a   :  { %v336_v44 = vadd.f32 %v330_v43, %v127_v42  ;;  %v135_v42 = vadd.f32 %v1418_v40, %v1392_v11 }
 0x38b   :  { %v1183_v45 = vpop.f32.mrf.mxu1 }
 0x38c   :  { %1268 = vtanh.f32 %v336_v44  ;;  %v1080_v49 = vmul.f32 -1.442695, %v336_v44 }
 0x38d   :  { %v333_v46 = vpop.f32.mrf.mxu1 }
 0x38e   :  { %1270 = vpow2.f32 %v1080_v49 }
 0x38f   :  { %v1184_v47 = vpop.f32.mrf.mxu1 }
 0x399   :  { %v1269_v48 = vpop.eup %1268 }
 0x39a   :  { %351 = vrot.lane.b32.xlu0 %v1269_v48, %s1326_s28 }
 0x39b   :  { %v1271_v50 = vpop.eup %1270 }
 0x39c   :  { %v340_v51 = vadd.f32 1.0, %v1271_v50 }
 0x39e   :  { %1272 = vrcp.f32 %v340_v51 }
 0x3ab   :  { %v1273_v52 = vpop.eup %1272 }
 0x3ac   :  { %v349_v56 = vmul.f32 %v1273_v52, %v347_v55 }
 0x40c   :  { %v352_v53 = vpop.permute.xlu0 %351 }
 0x40d   :  { %v354_v54 = vmul.f32 %v1273_v52, %v352_v53 }
 0x40f   :  { %356 = vrot.lane.b32.xlu0 %v354_v54, %s1327_s29 }
 0x481   :  { %v357_v57 = vpop.permute.xlu0 %356 }
 0x482   :  { %v359_v58 = vadd.f32 %v357_v57, %v349_v56 }
 0x484   :  { %1274 = vtanh.f32 %v359_v58 }
 0x491   :  { %v1275_v59 = vpop.eup %1274 }
 0x492   :  { %362 = vrot.lane.b32.xlu1 %v1275_v59, %s1326_s28  ;;  %v1252_v59 = vld [vmem:[%s1634_s2 + $0x8] sm:$0xff]  }
 0x496   :  { %367 = vrot.lane.b32.xlu1 %v359_v58, %s1328_s3 }
 0x504   :  { %v363_v1 = vpop.permute.xlu1 %362 }
 0x505   :  { %v1443_v2 = vmul.f32 %v1273_v52, %v363_v1 }
 0x507   :  { %372 = vrot.lane.b32.xlu0 %v1443_v2, %s1327_s29 }
 0x508   :  { %v368_v3 = vpop.permute.xlu1 %367 }
 0x509   :  { %370 = vst.msk [vmem:[#allocation3] sm:$0xff] %vm22_vm0, %v368_v3 }
 0x510   :  { %v456_v4 = vld [vmem:[#allocation3] sm:$0xff] }
 0x511   :  { %458 = vrot.lane.b32.xlu1 %v456_v4, %s1327_s29 }
 0x579   :  { %v373_v5 = vpop.permute.xlu0 %372 }
 0x57a   :  { %375 = vst.msk [vmem:[#allocation2] sm:$0xff] %vm22_vm0, %v373_v5 }
 0x581   :  { %v387_v6 = vld [vmem:[#allocation2] sm:$0xff] }
 0x582   :  { %v388_v7 = vpack.c.bf16 %v387_v6, %v387_v6  ;;  %v140_v6 = vadd.f32 %v1392_v11, %v1455_v9 }
 0x583   :  { %v459_v10 = vpop.permute.xlu1 %458 }
 0x584   :  { %1190 = vmatmul.mubr.msk.bf16.vlgmr.msra.gmra.mxu0 %vm22_vm0, %v388_v7 }
 0x585   :  { %1205 = vmatprep.mubr.msk.bf16.mxu0 %vm1325_vm1, %v1324_v0  ;;  %1202 = vmatpush3.bf16.msra.mxu0 %v1252_v59 }
 0x586   :  { %1203 = vmatprep.subr.bf16.mxu0 %v1324_v0 }
 0x589   :  { %1204 = vmatpush3.bf16.msra.mxu0 %v1253_v60 }
 0x58a   :  { %1217 = vmatprep.subr.bf16.mxu0 %v1324_v0 }
 0x644   :  { %v442_v15 = vpop.f32.mrf.mxu0 }
 0x645   :  { %v448_v16 = vadd.f32 %v442_v15, %v132_v14 }
 0x646   :  { %v1191_v17 = vpop.f32.mrf.mxu0 }
 0x647   :  { %1276 = vtanh.f32 %v448_v16  ;;  %v1086_v21 = vmul.f32 -1.442695, %v448_v16 }
 0x648   :  { %v445_v18 = vpop.f32.mrf.mxu0 }
 0x649   :  { %1278 = vpow2.f32 %v1086_v21 }
 0x64a   :  { %v1192_v19 = vpop.f32.mrf.mxu0 }
 0x654   :  { %v1277_v20 = vpop.eup %1276 }
 0x655   :  { %463 = vrot.lane.b32.xlu0 %v1277_v20, %s1326_s28 }
 0x656   :  { %v1279_v22 = vpop.eup %1278 }
 0x657   :  { %v452_v23 = vadd.f32 1.0, %v1279_v22 }
 0x659   :  { %1280 = vrcp.f32 %v452_v23 }
 0x666   :  { %v1281_v24 = vpop.eup %1280 }
 0x667   :  { %v461_v27 = vmul.f32 %v1281_v24, %v459_v10 }
 0x6c7   :  { %v464_v25 = vpop.permute.xlu0 %463 }
 0x6c8   :  { %v466_v26 = vmul.f32 %v1281_v24, %v464_v25 }
 0x6ca   :  { %468 = vrot.lane.b32.xlu0 %v466_v26, %s1327_s29 }
 0x73c   :  { %v469_v28 = vpop.permute.xlu0 %468 }
 0x73d   :  { %v471_v29 = vadd.f32 %v469_v28, %v461_v27  ;;  %v1254_v28 = vld [vmem:[%s1634_s2 + $0x8] sm:$0xff]  }
 0x73f   :  { %1282 = vtanh.f32 %v471_v29 }
 0x74c   :  { %v1283_v30 = vpop.eup %1282 }
 0x74d   :  { %474 = vrot.lane.b32.xlu1 %v1283_v30, %s1326_s28 }
 0x751   :  { %479 = vrot.lane.b32.xlu1 %v471_v29, %s1328_s3  ;;  %v1255_v29 = vld [vmem:[%s1634_s2] sm:$0xff]  }
 0x7bf   :  { %v475_v33 = vpop.permute.xlu1 %474 }
 0x7c0   :  { %v1475_v35 = vmul.f32 %v1281_v24, %v475_v33 }
 0x7c2   :  { %484 = vrot.lane.b32.xlu0 %v1475_v35, %s1327_s29 }
 0x7c3   :  { %v480_v36 = vpop.permute.xlu1 %479 }
 0x7c4   :  { %482 = vst.msk [vmem:[#allocation3] sm:$0xff] %vm22_vm0, %v480_v36 }
 0x7cb   :  { %v568_v37 = vld [vmem:[#allocation3] sm:$0xff] }
 0x7cc   :  { %570 = vrot.lane.b32.xlu1 %v568_v37, %s1327_s29 }
 0x834   :  { %v485_v38 = vpop.permute.xlu0 %484 }
 0x835   :  { %487 = vst.msk [vmem:[#allocation2] sm:$0xff] %vm22_vm0, %v485_v38 }
 0x83c   :  { %v499_v39 = vld [vmem:[#allocation2] sm:$0xff] }
 0x83d   :  { %v500_v41 = vpack.c.bf16 %v499_v39, %v499_v39  ;;  %v143_v39 = vadd.f32 %v1392_v11, %v1459_v13 }
 0x83e   :  { %v571_v40 = vpop.permute.xlu1 %570 }
 0x83f   :  { %1198 = vmatmul.mubr.msk.bf16.vlgmr.msra.gmra.mxu1 %vm22_vm0, %v500_v41 }
 0x840   :  { %1213 = vmatprep.mubr.msk.bf16.mxu1 %vm1325_vm1, %v1324_v0  ;;  %1210 = vmatpush3.bf16.msra.mxu1 %v1254_v28 }
 0x841   :  { %1211 = vmatprep.subr.bf16.mxu1 %v1324_v0 }
 0x844   :  { %1212 = vmatpush3.bf16.msra.mxu1 %v1255_v29 }
 0x845   :  { %1225 = vmatprep.subr.bf16.mxu1 %v1324_v0 }
 0x8ff   :  { %v554_v43 = vpop.f32.mrf.mxu1 }
 0x900   :  { %v560_v44 = vadd.f32 %v554_v43, %v135_v42 }
 0x901   :  { %v1199_v45 = vpop.f32.mrf.mxu1 }
 0x902   :  { %1284 = vtanh.f32 %v560_v44  ;;  %v1092_v49 = vmul.f32 -1.442695, %v560_v44 }
 0x903   :  { %v557_v46 = vpop.f32.mrf.mxu1 }
 0x904   :  { %1286 = vpow2.f32 %v1092_v49 }
 0x905   :  { %v1200_v47 = vpop.f32.mrf.mxu1 }
 0x90f   :  { %v1285_v48 = vpop.eup %1284 }
 0x910   :  { %575 = vrot.lane.b32.xlu0 %v1285_v48, %s1326_s28 }
 0x911   :  { %v1287_v50 = vpop.eup %1286 }
 0x912   :  { %v564_v51 = vadd.f32 1.0, %v1287_v50 }
 0x914   :  { %1288 = vrcp.f32 %v564_v51 }
 0x921   :  { %v1289_v52 = vpop.eup %1288 }
 0x922   :  { %v573_v55 = vmul.f32 %v1289_v52, %v571_v40 }
 0x982   :  { %v576_v53 = vpop.permute.xlu0 %575 }
 0x983   :  { %v578_v54 = vmul.f32 %v1289_v52, %v576_v53 }
 0x985   :  { %580 = vrot.lane.b32.xlu0 %v578_v54, %s1327_s29 }
 0x9f7   :  { %v581_v56 = vpop.permute.xlu0 %580 }
 0x9f8   :  { %v583_v57 = vadd.f32 %v581_v56, %v573_v55  ;;  %v1256_v56 = vld [vmem:[%s1634_s2 + $0x8] sm:$0xff]  }
 0x9fa   :  { %1290 = vtanh.f32 %v583_v57 }
 0xa07   :  { %v1291_v58 = vpop.eup %1290 }
 0xa08   :  { %586 = vrot.lane.b32.xlu1 %v1291_v58, %s1326_s28 }
 0xa0c   :  { %591 = vrot.lane.b32.xlu1 %v583_v57, %s1328_s3  ;;  %v1257_v57 = vld [vmem:[%s1634_s2] sm:$0xff]  }
 0xa7a   :  { %v587_v61 = vpop.permute.xlu1 %586 }
 0xa7b   :  { %v1499_v62 = vmul.f32 %v1289_v52, %v587_v61 }
 0xa7d   :  { %596 = vrot.lane.b32.xlu0 %v1499_v62, %s1327_s29 }
 0xa7e   :  { %v592_v63 = vpop.permute.xlu1 %591 }
 0xa7f   :  { %594 = vst.msk [vmem:[#allocation3] sm:$0xff] %vm22_vm0, %v592_v63 }
 0xa86   :  { %v680_v1 = vld [vmem:[#allocation3] sm:$0xff] }
 0xa87   :  { %682 = vrot.lane.b32.xlu1 %v680_v1, %s1327_s29 }
 0xaef   :  { %v597_v3 = vpop.permute.xlu0 %596 }
 0xaf0   :  { %599 = vst.msk [vmem:[#allocation2] sm:$0xff] %vm22_vm0, %v597_v3 }
 0xaf7   :  { %v611_v4 = vld [vmem:[#allocation2] sm:$0xff] }
 0xaf8   :  { %v612_v5 = vpack.c.bf16 %v611_v4, %v611_v4  ;;  %v148_v4 = vadd.f32 %v1453_v8, %v1392_v11 }
 0xaf9   :  { %v683_v9 = vpop.permute.xlu1 %682 }
 0xafa   :  { %1206 = vmatmul.mubr.msk.bf16.vlgmr.msra.gmra.mxu0 %vm22_vm0, %v612_v5 }
 0xafb   :  { %1221 = vmatprep.mubr.msk.bf16.mxu0 %vm1325_vm1, %v1324_v0  ;;  %1218 = vmatpush3.bf16.msra.mxu0 %v1256_v56  ;;  %v1120_v56 = vpack.c.bf16 %v1443_v2, %v1443_v2 }
 0xafc   :  { %1219 = vmatprep.subr.bf16.mxu0 %v1324_v0 }
 0xaff   :  { %1220 = vmatpush3.bf16.msra.mxu0 %v1257_v57  ;;  %v1122_v57 = vpack.c.bf16 %v1499_v62, %v1499_v62 }
 0xbba   :  { %v666_v7 = vpop.f32.mrf.mxu0 }
 0xbbb   :  { %v672_v14 = vadd.f32 %v666_v7, %v140_v6 }
 0xbbc   :  { %v1207_v15 = vpop.f32.mrf.mxu0 }
 0xbbd   :  { %1292 = vtanh.f32 %v672_v14  ;;  %v1098_v19 = vmul.f32 -1.442695, %v672_v14 }
 0xbbe   :  { %v669_v16 = vpop.f32.mrf.mxu0 }
 0xbbf   :  { %1294 = vpow2.f32 %v1098_v19 }
 0xbc0   :  { %v1208_v17 = vpop.f32.mrf.mxu0 }
 0xbca   :  { %v1293_v18 = vpop.eup %1292 }
 0xbcb   :  { %687 = vrot.lane.b32.xlu0 %v1293_v18, %s1326_s28 }
 0xbcc   :  { %v1295_v20 = vpop.eup %1294 }
 0xbcd   :  { %v676_v21 = vadd.f32 1.0, %v1295_v20 }
 0xbcf   :  { %1296 = vrcp.f32 %v676_v21 }
 0xbdc   :  { %v1297_v22 = vpop.eup %1296 }
 0xbdd   :  { %v685_v25 = vmul.f32 %v1297_v22, %v683_v9 }
 0xc3d   :  { %v688_v23 = vpop.permute.xlu0 %687 }
 0xc3e   :  { %v690_v24 = vmul.f32 %v1297_v22, %v688_v23 }
 0xc40   :  { %692 = vrot.lane.b32.xlu0 %v690_v24, %s1327_s29 }
 0xcb2   :  { %v693_v26 = vpop.permute.xlu0 %692 }
 0xcb3   :  { %v695_v10 = vadd.f32 %v693_v26, %v685_v25  ;;  %v1258_v26 = vld [vmem:[%s1634_s2 + $0x8] sm:$0xff]  }
 0xcb5   :  { %1298 = vtanh.f32 %v695_v10 }
 0xcc2   :  { %v1299_v27 = vpop.eup %1298 }
 0xcc3   :  { %698 = vrot.lane.b32.xlu1 %v1299_v27, %s1326_s28 }
 0xcc7   :  { %703 = vrot.lane.b32.xlu1 %v695_v10, %s1328_s3  ;;  %v1259_v10 = vld [vmem:[%s1634_s2] sm:$0xff]  }
 0xd35   :  { %v699_v30 = vpop.permute.xlu1 %698 }
 0xd36   :  { %v1523_v31 = vmul.f32 %v1297_v22, %v699_v30 }
 0xd38   :  { %708 = vrot.lane.b32.xlu0 %v1523_v31, %s1327_s29 }
 0xd39   :  { %v704_v32 = vpop.permute.xlu1 %703 }
 0xd3a   :  { %706 = vst.msk [vmem:[#allocation3] sm:$0xff] %vm22_vm0, %v704_v32 }
 0xd41   :  { %v792_v33 = vld [vmem:[#allocation3] sm:$0xff] }
 0xd42   :  { %794 = vrot.lane.b32.xlu1 %v792_v33, %s1327_s29 }
 0xdaa   :  { %v709_v36 = vpop.permute.xlu0 %708 }
 0xdab   :  { %711 = vst.msk [vmem:[#allocation2] sm:$0xff] %vm22_vm0, %v709_v36 }
 0xdb2   :  { %v723_v37 = vld [vmem:[#allocation2] sm:$0xff] }
 0xdb3   :  { %v724_v38 = vpack.c.bf16 %v723_v37, %v723_v37 }
 0xdb4   :  { %v795_v13 = vpop.permute.xlu1 %794 }
 0xdb5   :  { %1214 = vmatmul.mubr.msk.bf16.vlgmr.msra.gmra.mxu1 %vm22_vm0, %v724_v38 }
 0xdb6   :  { %1229 = vmatprep.mubr.msk.bf16.mxu1 %vm1325_vm1, %v1324_v0  ;;  %1226 = vmatpush3.bf16.msra.mxu1 %v1258_v26 }
 0xdb7   :  { %1227 = vmatprep.subr.bf16.mxu1 %v1324_v0  ;;  %v151_v0 = vadd.f32 %v1457_v12, %v1392_v11  ;;  %v1119_v11 = vpack.c.bf16 %v1408_v34, %v1408_v34  ;;  %v1121_v12 = vpack.c.bf16 %v1475_v35, %v1475_v35 }
 0xdba   :  { %1228 = vmatpush3.bf16.msra.mxu1 %v1259_v10 }
 0xe75   :  { %v778_v41 = vpop.f32.mrf.mxu1 }
 0xe76   :  { %v784_v42 = vadd.f32 %v778_v41, %v143_v39 }
 0xe77   :  { %v1215_v43 = vpop.f32.mrf.mxu1 }
 0xe78   :  { %1300 = vtanh.f32 %v784_v42  ;;  %v1104_v47 = vmul.f32 -1.442695, %v784_v42 }
 0xe79   :  { %v781_v44 = vpop.f32.mrf.mxu1 }
 0xe7a   :  { %1302 = vpow2.f32 %v1104_v47 }
 0xe7b   :  { %v1216_v45 = vpop.f32.mrf.mxu1 }
 0xe85   :  { %v1301_v46 = vpop.eup %1300 }
 0xe86   :  { %799 = vrot.lane.b32.xlu0 %v1301_v46, %s1326_s28 }
 0xe87   :  { %v1303_v48 = vpop.eup %1302 }
 0xe88   :  { %v788_v49 = vadd.f32 1.0, %v1303_v48 }
 0xe8a   :  { %1304 = vrcp.f32 %v788_v49 }
 0xe97   :  { %v1305_v50 = vpop.eup %1304 }
 0xe98   :  { %v797_v53 = vmul.f32 %v1305_v50, %v795_v13 }
 0xef8   :  { %v800_v51 = vpop.permute.xlu0 %799 }
 0xef9   :  { %v802_v52 = vmul.f32 %v1305_v50, %v800_v51 }
 0xefb   :  { %804 = vrot.lane.b32.xlu0 %v802_v52, %s1327_s29 }
 0xf6d   :  { %v805_v54 = vpop.permute.xlu0 %804 }
 0xf6e   :  { %v807_v40 = vadd.f32 %v805_v54, %v797_v53 }
 0xf70   :  { %1306 = vtanh.f32 %v807_v40 }
 0xf7d   :  { %v1307_v55 = vpop.eup %1306 }
 0xf7e   :  { %810 = vrot.lane.b32.xlu1 %v1307_v55, %s1326_s28 }
 0xf82   :  { %815 = vrot.lane.b32.xlu1 %v807_v40, %s1328_s3 }
 0xff0   :  { %v811_v58 = vpop.permute.xlu1 %810 }
 0xff1   :  { %v1546_v59 = vmul.f32 %v1305_v50, %v811_v58  ;;  %v1123_v50 = vpack.c.bf16 %v1523_v31, %v1523_v31 }
 0xff3   :  { %820 = vrot.lane.b32.xlu0 %v1546_v59, %s1327_s29  ;;  %v1124_v58 = vpack.c.bf16 %v1546_v59, %v1546_v59 }
 0xff4   :  { %v816_v60 = vpop.permute.xlu1 %815 }
 0xff5   :  { %818 = vst.msk [vmem:[#allocation3] sm:$0xff] %vm22_vm0, %v816_v60 }
 0xffc   :  { %v904_v61 = vld [vmem:[#allocation3] sm:$0xff] }
 0xffd   :  { %906 = vrot.lane.b32.xlu1 %v904_v61, %s1327_s29 }
0x1065   :  { %v821_v63 = vpop.permute.xlu0 %820 }
0x1066   :  { %823 = vst.msk [vmem:[#allocation2] sm:$0xff] %vm22_vm0, %v821_v63 }
0x106d   :  { %v835_v1 = vld [vmem:[#allocation2] sm:$0xff] }
0x106e   :  { %v836_v3 = vpack.c.bf16 %v835_v1, %v835_v1 }
0x106f   :  { %v907_v8 = vpop.permute.xlu1 %906 }
0x1070   :  { %1222 = vmatmul.mubr.msk.bf16.vlgmr.msra.gmra.mxu0 %vm22_vm0, %v836_v3 }
0x1130   :  { %v890_v5 = vpop.f32.mrf.mxu0 }
0x1131   :  { %v896_v6 = vadd.f32 %v890_v5, %v148_v4 }
0x1132   :  { %v1223_v7 = vpop.f32.mrf.mxu0 }
0x1133   :  { %1308 = vtanh.f32 %v896_v6  ;;  %v1110_v17 = vmul.f32 -1.442695, %v896_v6 }
0x1134   :  { %v893_v14 = vpop.f32.mrf.mxu0 }
0x1135   :  { %1310 = vpow2.f32 %v1110_v17 }
0x1136   :  { %v1224_v15 = vpop.f32.mrf.mxu0 }
0x1140   :  { %v1309_v16 = vpop.eup %1308 }
0x1141   :  { %911 = vrot.lane.b32.xlu0 %v1309_v16, %s1326_s28 }
0x1142   :  { %v1311_v18 = vpop.eup %1310 }
0x1143   :  { %v900_v19 = vadd.f32 1.0, %v1311_v18 }
0x1145   :  { %1312 = vrcp.f32 %v900_v19 }
0x1152   :  { %v1313_v20 = vpop.eup %1312 }
0x1153   :  { %v909_v23 = vmul.f32 %v1313_v20, %v907_v8 }
0x11b3   :  { %v912_v21 = vpop.permute.xlu0 %911 }
0x11b4   :  { %v914_v22 = vmul.f32 %v1313_v20, %v912_v21 }
0x11b6   :  { %916 = vrot.lane.b32.xlu0 %v914_v22, %s1327_s29 }
0x1228   :  { %v917_v24 = vpop.permute.xlu0 %916 }
0x1229   :  { %v919_v9 = vadd.f32 %v917_v24, %v909_v23 }
0x122b   :  { %1314 = vtanh.f32 %v919_v9 }
0x1238   :  { %v1315_v25 = vpop.eup %1314 }
0x1239   :  { %922 = vrot.lane.b32.xlu1 %v1315_v25, %s1326_s28 }
0x123d   :  { %927 = vrot.lane.b32.xlu1 %v919_v9, %s1328_s3 }
0x12ab   :  { %v923_v27 = vpop.permute.xlu1 %922 }
0x12ac   :  { %v925_v28 = vmul.f32 %v1313_v20, %v923_v27 }
0x12ae   :  { %932 = vrot.lane.b32.xlu0 %v925_v28, %s1327_s29  ;;  %v1125_v51 = vpack.c.bf16 %v925_v28, %v925_v28 }
0x12af   :  { %v928_v29 = vpop.permute.xlu1 %927 }
0x12b0   :  { %930 = vst.msk [vmem:[#allocation3] sm:$0xff] %vm22_vm0, %v928_v29 }
0x12b7   :  { %v1016_v30 = vld [vmem:[#allocation3] sm:$0xff] }
0x12b8   :  { %1018 = vrot.lane.b32.xlu1 %v1016_v30, %s1327_s29 }
0x1320   :  { %v933_v32 = vpop.permute.xlu0 %932 }
0x1321   :  { %935 = vst.msk [vmem:[#allocation2] sm:$0xff] %vm22_vm0, %v933_v32 }
0x1328   :  { %v947_v33 = vld [vmem:[#allocation2] sm:$0xff] }
0x1329   :  { %v948_v36 = vpack.c.bf16 %v947_v33, %v947_v33 }
0x132a   :  { %v1019_v52 = vpop.permute.xlu1 %1018 }
0x132b   :  { %1230 = vmatmul.mubr.msk.bf16.vlgmr.msra.gmra.mxu1 %vm22_vm0, %v948_v36 }
0x13eb   :  { %v1002_v37 = vpop.f32.mrf.mxu1 }
0x13ec   :  { %v1008_v38 = vadd.f32 %v1002_v37, %v151_v0 }
0x13ed   :  { %v1231_v39 = vpop.f32.mrf.mxu1 }
0x13ee   :  { %1316 = vtanh.f32 %v1008_v38  ;;  %v1116_v44 = vmul.f32 -1.442695, %v1008_v38 }
0x13ef   :  { %v1005_v41 = vpop.f32.mrf.mxu1 }
0x13f0   :  { %1318 = vpow2.f32 %v1116_v44 }
0x13f1   :  { %v1232_v42 = vpop.f32.mrf.mxu1 }
0x13fb   :  { %v1317_v43 = vpop.eup %1316 }
0x13fc   :  { %1023 = vrot.lane.b32.xlu0 %v1317_v43, %s1326_s28 }
0x13fd   :  { %v1319_v45 = vpop.eup %1318 }
0x13fe   :  { %v1012_v46 = vadd.f32 1.0, %v1319_v45 }
0x1400   :  { %1320 = vrcp.f32 %v1012_v46 }
0x140d   :  { %v1321_v47 = vpop.eup %1320 }
0x140e   :  { %v1021_v13 = vmul.f32 %v1321_v47, %v1019_v52 }
0x146e   :  { %v1024_v48 = vpop.permute.xlu0 %1023 }
0x146f   :  { %v1026_v49 = vmul.f32 %v1321_v47, %v1024_v48 }
0x1471   :  { %1028 = vrot.lane.b32.xlu0 %v1026_v49, %s1327_s29 }
0x1475   :  { %268 = vrot.lane.b32.xlu0 %v1119_v11, %s1327_s29 }
0x1479   :  { %492 = vrot.lane.b32.xlu0 %v1121_v12, %s1327_s29 }
0x147d   :  { %716 = vrot.lane.b32.xlu0 %v1123_v50, %s1327_s29 }
0x1481   :  { %940 = vrot.lane.b32.xlu0 %v1125_v51, %s1327_s29 }
0x14e3   :  { %v1029_v53 = vpop.permute.xlu0 %1028 }
0x14e4   :  { %v1031_v54 = vadd.f32 %v1029_v53, %v1021_v13 }
0x14e6   :  { %1322 = vtanh.f32 %v1031_v54 }
0x14e7   :  { %v269_v34 = vpop.permute.xlu0 %268 }
0x14e8   :  { %272 = vst.msk [vmem:[%s1637_s4] sm:$0xf] %vm271_vm2, %v269_v34 }
0x14eb   :  { %v493_v35 = vpop.permute.xlu0 %492 }
0x14ec   :  { %1088 = vst.msk [vmem:[%s1637_s4 + $0x8] sm:$0xf] %vm271_vm2, %v493_v35 }
0x14ef   :  { %v717_v31 = vpop.permute.xlu0 %716 }
0x14f0   :  { %1100 = vst.msk [vmem:[%s1637_s4 + $0x10] sm:$0xf] %vm271_vm2, %v717_v31 }
0x14f3   :  { %v1323_v40 = vpop.eup %1322  ;;  %v941_v55 = vpop.permute.xlu0 %940 }
0x14f4   :  { %1112 = vst.msk [vmem:[%s1637_s4 + $0x18] sm:$0xf] %vm271_vm2, %v941_v55  ;;  %1034 = vrot.lane.b32.xlu1 %v1323_v40, %s1326_s28 }
0x14f8   :  { %380 = vrot.lane.b32.xlu1 %v1120_v56, %s1327_s29 }
0x14fc   :  { %604 = vrot.lane.b32.xlu1 %v1122_v57, %s1327_s29 }
0x1500   :  { %828 = vrot.lane.b32.xlu1 %v1124_v58, %s1327_s29 }
0x1504   :  { %1039 = vrot.lane.b32.xlu1 %v1031_v54, %s1328_s3 }
0x1566   :  { %v1035_v60 = vpop.permute.xlu1 %1034 }
0x1567   :  { %v1037_v61 = vmul.f32 %v1321_v47, %v1035_v60 }
0x1569   :  { %v1126_v63 = vpack.c.bf16 %v1037_v61, %v1037_v61  ;;  %1044 = vrot.lane.b32.xlu0 %v1037_v61, %s1327_s29 }
0x156a   :  { %v381_v2 = vpop.permute.xlu1 %380 }
0x156b   :  { %1082 = vst.msk [vmem:[%s1637_s4 + $0x4] sm:$0xf] %vm271_vm2, %v381_v2  ;;  %1052 = vrot.lane.b32.xlu1 %v1126_v63, %s1327_s29 }
0x156e   :  { %v605_v62 = vpop.permute.xlu1 %604 }
0x156f   :  { %1094 = vst.msk [vmem:[%s1637_s4 + $0xc] sm:$0xf] %vm271_vm2, %v605_v62 }
0x1572   :  { %v829_v59 = vpop.permute.xlu1 %828 }
0x1573   :  { %1106 = vst.msk [vmem:[%s1637_s4 + $0x14] sm:$0xf] %vm271_vm2, %v829_v59 }
0x1576   :  { %v1040_v1 = vpop.permute.xlu1 %1039 }
0x1577   :  { %1042 = vst.msk [vmem:[#allocation3] sm:$0xff] %vm22_vm0, %v1040_v1 }
0x15db   :  { %v1045_v3 = vpop.permute.xlu0 %1044 }
0x15dc   :  { %1047 = vst.msk [vmem:[#allocation2] sm:$0xff] %vm22_vm0, %v1045_v3 }
0x15dd   :  { %v1053_v4 = vpop.permute.xlu1 %1052 }
0x15de   :  { %1118 = vst.msk [vmem:[%s1637_s4 + $0x1c] sm:$0xf] %vm271_vm2, %v1053_v4 }

</bundles_post_ra>
